<compile_context>
chip_gen: v5e
topology: v5e:2x2
jax: 0.10.0
libtpu: 0.0.40
codegen_flags: <defaults>
</compile_context>

<pallas_src>
from functools import partial, reduce

import numpy as np
import jax
import jax.numpy as jnp
from jax.experimental import pallas as pl
from jax.experimental.pallas import tpu as pltpu


# ----------------------------------------------------------------------------
# Kernels
# ----------------------------------------------------------------------------
def _merge_pair_kernel(u_ref, s0r_ref, s1r_ref, s0i_ref, s1i_ref,
                       o_r_ref, o_i_ref):
    """Produce output row i = program_id(2) of the per-batch 2x2 unitary.

    u_ref:  (8, TL) lane pattern, rows =
            [re u00, re u01, im u00, im u01, re u10, re u11, im u10, im u11],
            each repeated with period B along the lane axis.
    s*_ref: (TP, TL) dense state tiles (target-qubit value 0 / 1, re / im).
    o*_ref: (TP, TL) output tiles for target-qubit value i.
    """
    i = pl.program_id(2)
    u = u_ref[...]
    # Select U[i, :] with an arithmetic blend (i is 0 or 1).  This keeps the
    # u BlockSpec index constant, so its tiny tile is DMA'd exactly once.
    fi = i.astype(jnp.float32)
    coeff = u[0:4] + fi * (u[4:8] - u[0:4])          # (4, TL)
    ar, br, ai, bi = coeff[0:1], coeff[1:2], coeff[2:3], coeff[3:4]

    s0r = s0r_ref[...]
    s1r = s1r_ref[...]
    s0i = s0i_ref[...]
    s1i = s1i_ref[...]

    # out_i = U[i,0] * s0 + U[i,1] * s1   (split-complex arithmetic)
    o_r_ref[...] = ar * s0r - ai * s0i + br * s1r - bi * s1i
    o_i_ref[...] = ar * s0i + ai * s0r + br * s1i + bi * s1r


def _merge_qmid_kernel(u_ref, s_r_ref, s_i_ref, o_r_ref, o_i_ref):
    """Fallback kernel: the target-qubit axis lives inside the block.

    s/o refs: (TP, 2, POSTB);  u_ref: (8, POSTB) lane pattern (same row layout
    as above).  DMA stays big and contiguous; the VPU runs sparse (only used
    when POSTB has no 128-aligned tiling).
    """
    u = u_ref[...]
    a0r, b0r, a0i, b0i = u[0:1], u[1:2], u[2:3], u[3:4]
    a1r, b1r, a1i, b1i = u[4:5], u[5:6], u[6:7], u[7:8]

    s_r = s_r_ref[...]
    s_i = s_i_ref[...]
    s0r, s1r = s_r[:, 0, :], s_r[:, 1, :]
    s0i, s1i = s_i[:, 0, :], s_i[:, 1, :]

    o0r = a0r * s0r - a0i * s0i + b0r * s1r - b0i * s1i
    o0i = a0r * s0i + a0i * s0r + b0r * s1i + b0i * s1r
    o1r = a1r * s0r - a1i * s0i + b1r * s1r - b1i * s1i
    o1i = a1r * s0i + a1i * s0r + b1r * s1i + b1i * s1r

    o_r_ref[...] = jnp.stack([o0r, o1r], axis=1)
    o_i_ref[...] = jnp.stack([o0i, o1i], axis=1)


# ----------------------------------------------------------------------------
# Tiling / VMEM planning
# ----------------------------------------------------------------------------
_LANE_TARGET = 2048    # f32 elements along the lane axis per block


def _device_budget():
    """Per-plane block budget (f32 elems) and vmem_limit_bytes, derived from
    the device VMEM capacity (64 MiB/TC on v7x, 128 MiB on v5e/v6e)."""
    cap = 64 * 1024 * 1024                       # conservative default (v7x)
    try:
        cap = int(pltpu.get_tpu_info().vmem_capacity_bytes)
    except Exception:
        pass
    plane_elems = (1 << 19) if cap >= 100 * 1024 * 1024 else (1 << 18)
    # 6 state blocks (4 in + 2 out), double buffered, + u tile + headroom.
    need = 6 * 2 * plane_elems * 4 + (2 << 20)
    vmem_limit = max(need, min(cap * 3 // 5, 96 * 1024 * 1024))
    return plane_elems, int(vmem_limit)


def _lane_tiles(extent, batch):
    """Lane-tile candidates: batch * 2**j, dividing `extent`, multiple of 128."""
    out = []
    t = batch
    while t <= extent and extent % t == 0:
        if t % 128 == 0:
            out.append(t)
        t *= 2
    return out


def _sublane_tiles(extent):
    """Sublane-tile candidates: power-of-two multiples of 8 dividing `extent`."""
    out = []
    t = 8
    while t <= extent and extent % t == 0:
        out.append(t)
        t *= 2
    return out


# ----------------------------------------------------------------------------
# Wrapper: apply_operator(state, merged_unitary, (qubit,)) on split planes
# ----------------------------------------------------------------------------
@partial(jax.jit, static_argnums=(3,))
def apply_merged_unitary(state_re, state_im, u, qubit):
    """Apply a batched 2x2 unitary to the target qubit of a split-plane state.

    state_re, state_im: float32, shape (2,)*n_qubits + (B,)  (persistent planes)
    u:                  complex64, shape (2, 2, B)           (merged unitary)
    Returns (out_re, out_im) with the same shapes as the inputs.
    """
    n = state_re.ndim - 1
    B = state_re.shape[-1]
    assert 0 <= qubit < n
    PRE = 1 << qubit                        # qubits before the target
    POSTB = (1 << (n - 1 - qubit)) * B      # qubits after the target, x batch

    plane_elems, vmem_limit = _device_budget()
    lane_target = min(_LANE_TARGET, plane_elems // 8)
    big_state = PRE * 2 * POSTB >= (1 << 19)

    # (8, B) unitary rows; tiled to (8, TL) below once TL is known.
    ur = jnp.real(u).astype(jnp.float32)
    ui = jnp.imag(u).astype(jnp.float32)
    u_rows = jnp.stack([ur[0, 0], ur[0, 1], ui[0, 0], ui[0, 1],
                        ur[1, 0], ur[1, 1], ui[1, 0], ui[1, 1]], axis=0)

    lanes_post = _lane_tiles(POSTB, B)

    if PRE >= 8 and lanes_post:
        # ---- mode "pre-rows": sublanes from the pre-qubit axis. -------------
        fits = [t for t in lanes_post if t <= lane_target]
        TL = max(fits) if fits else min(lanes_post)
        subs = [t for t in _sublane_tiles(PRE) if t * TL <= plane_elems] or [8]
        TP = max(subs)
        # v7x megacore: keep >= 2 parallel grid steps for non-tiny states.
        if (PRE // TP) * (POSTB // TL) < 2 and big_state:
            if TP >= 16:
                TP //= 2
            elif TL // 2 in lanes_post:
                TL //= 2
        NLB = POSTB // TL                    # lane blocks per qubit slab
        view = (PRE, 2 * POSTB)
        grid = (PRE // TP, NLB, 2)
        blk = (TP, TL)
        spec_q0 = pl.BlockSpec(blk, lambda p, l, i: (p, l))
        spec_q1 = pl.BlockSpec(blk, lambda p, l, i: (p, l + NLB))
        spec_out = pl.BlockSpec(blk, lambda p, l, i: (p, l + i * NLB))
        spec_u = pl.BlockSpec((8, TL), lambda p, l, i: (0, 0))
        kernel = _merge_pair_kernel
        sem = ("parallel", "parallel", "arbitrary")
        sre = state_re.reshape(view)
        sim = state_im.reshape(view)
        in_specs = [spec_u, spec_q0, spec_q1, spec_q0, spec_q1]
        out_specs = [spec_out, spec_out]
        operands = (sre, sre, sim, sim)
    elif any(POSTB // t >= 8 for t in lanes_post):
        # ---- mode "post-rows": PRE < 8, take sublanes from post/batch. ------
        opts = [t for t in lanes_post if POSTB // t >= 8]
        fits = [t for t in opts if t <= lane_target]
        LANE = max(fits) if fits else min(opts)
        POST_HI = POSTB // LANE
        TL = LANE
        subs = [t for t in _sublane_tiles(POST_HI) if t * TL <= plane_elems] or [8]
        TP = max(subs)
        if PRE * (POST_HI // TP) < 2 and big_state and TP >= 16:
            TP //= 2
        view = (PRE, 2, POST_HI, LANE)
        grid = (PRE, POST_HI // TP, 2)
        blk = (None, None, TP, TL)
        spec_q0 = pl.BlockSpec(blk, lambda p, h, i: (p, 0, h, 0))
        spec_q1 = pl.BlockSpec(blk, lambda p, h, i: (p, 1, h, 0))
        spec_out = pl.BlockSpec(blk, lambda p, h, i: (p, i, h, 0))
        spec_u = pl.BlockSpec((8, TL), lambda p, h, i: (0, 0))
        kernel = _merge_pair_kernel
        sem = ("parallel", "parallel", "arbitrary")
        sre = state_re.reshape(view)
        sim = state_im.reshape(view)
        in_specs = [spec_u, spec_q0, spec_q1, spec_q0, spec_q1]
        out_specs = [spec_out, spec_out]
        operands = (sre, sre, sim, sim)
    else:
        # ---- fallback: POSTB has no 128-aligned lane tile (qubit near n-1 /
        # tiny batch).  Keep the qubit axis inside the block: DMA contiguous,
        # grid small; the VPU is lane-sparse here (documented cliff).
        TL = POSTB
        lane_pad = -(-POSTB // 128) * 128
        cap_rows = max(1, plane_elems // (8 * lane_pad))
        TP = 1
        while TP * 2 <= cap_rows and PRE % (TP * 2) == 0:
            TP *= 2
        view = (PRE, 2, POSTB)
        grid = (PRE // TP,)
        blk = (TP, 2, POSTB)
        spec_s = pl.BlockSpec(blk, lambda p: (p, 0, 0))
        spec_u = pl.BlockSpec((8, POSTB), lambda p: (0, 0))
        kernel = _merge_qmid_kernel
        sem = ("parallel",)
        sre = state_re.reshape(view)
        sim = state_im.reshape(view)
        in_specs = [spec_u, spec_s, spec_s]
        out_specs = [spec_s, spec_s]
        operands = (sre, sim)

    u_pat = jnp.tile(u_rows, (1, TL // B))   # (8, TL), tiny

    out_re, out_im = pl.pallas_call(
        kernel,
        out_shape=(jax.ShapeDtypeStruct(view, jnp.float32),
                   jax.ShapeDtypeStruct(view, jnp.float32)),
        grid_spec=pltpu.PrefetchScalarGridSpec(
            num_scalar_prefetch=0,
            grid=grid,
            in_specs=in_specs,
            out_specs=out_specs,
        ),
        compiler_params=pltpu.CompilerParams(
            dimension_semantics=sem,
            vmem_limit_bytes=vmem_limit),
    )(u_pat, *operands)

    return out_re.reshape(state_re.shape), out_im.reshape(state_im.shape)


# ----------------------------------------------------------------------------
# Deterministic single-qubit gates + Merge.unitary() (tiny plain-JAX glue)
# ----------------------------------------------------------------------------
def rx(theta):
    c, s = jnp.cos(theta / 2), jnp.sin(theta / 2)
    return jnp.array([[c, -1j * s], [-1j * s, c]], dtype=jnp.complex64)


def ry(theta):
    c, s = jnp.cos(theta / 2), jnp.sin(theta / 2)
    return jnp.array([[c, -s], [s, c]], dtype=jnp.complex64)


def rz(theta):
    e = jnp.exp(-1j * theta / 2)
    return jnp.array([[e, 0.0], [0.0, jnp.conj(e)]], dtype=jnp.complex64)


def merged_unitary(op_mats, batch_size):
    """Merge.unitary(): reduce(einsum('ijb,jkb->ikb'), reversed(batched ops))."""
    batched = [jnp.broadcast_to(g[:, :, None],
                                (2, 2, batch_size)).astype(jnp.complex64)
               for g in op_mats]
    return reduce(lambda u0, u1: jnp.einsum('ijb,jkb->ikb', u0, u1),
                  reversed(batched))


# ----------------------------------------------------------------------------
# NumPy reference (test harness only; not part of the simulation path)
# ----------------------------------------------------------------------------
def apply_operator_ref(state_re, state_im, u, qubit):
    st = np.asarray(state_re).astype(np.complex64) \
        + 1j * np.asarray(state_im).astype(np.complex64)
    n = st.ndim - 1
    B = st.shape[-1]
    PRE = 1 << qubit
    POST = 1 << (n - 1 - qubit)
    st4 = st.reshape(PRE, 2, POST, B)
    out = np.einsum('ijb,pjtb->pitb', np.asarray(u), st4)
    return out.reshape(st.shape)


# ----------------------------------------------------------------------------
if __name__ == "__main__":
    n_qubits = 10
    batch = 8

    key = jax.random.PRNGKey(0)
    k1, k2 = jax.random.split(key)
    shape = (2,) * n_qubits + (batch,)
    # Persistent simulator state: split re/im float32 planes (no complex
    # arrays anywhere on the simulation path).
    state_re = jax.random.normal(k1, shape, dtype=jnp.float32)
    state_im = jax.random.normal(k2, shape, dtype=jnp.float32)

    # Merge([RX(0.3), RY(0.7), RZ(1.1)]) on a single qubit, deterministic params.
    ops = [rx(jnp.float32(0.3)), ry(jnp.float32(0.7)), rz(jnp.float32(1.1))]
    u = merged_unitary(ops, batch)            # (2, 2, batch) complex64

    # qubit 3 -> "pre-rows" mode, qubit 0 -> "post-rows" mode, qubit 9 -> fallback.
    for qubit in (3, 0, 9):
        out_re, out_im = apply_merged_unitary(state_re, state_im, u, qubit)
        out_re, out_im = jax.block_until_ready((out_re, out_im))
        got = np.asarray(out_re) + 1j * np.asarray(out_im)
        ref = apply_operator_ref(state_re, state_im, u, qubit)
        np.testing.assert_allclose(got, ref, rtol=1e-5, atol=1e-5)

    print("KERNEL_OK")
</pallas_src>

<mosaic_0001>
module attributes {stable_mosaic.version = 11 : i64} {
  func.func @_merge_pair_kernel(%arg0: i32, %arg1: i32, %arg2: i32, %arg3: memref<8x512xf32, #tpu.memory_space<vmem>>, %arg4: memref<8x512xf32, #tpu.memory_space<vmem>>, %arg5: memref<8x512xf32, #tpu.memory_space<vmem>>, %arg6: memref<8x512xf32, #tpu.memory_space<vmem>>, %arg7: memref<8x512xf32, #tpu.memory_space<vmem>>, %arg8: memref<8x512xf32, #tpu.memory_space<vmem>>, %arg9: memref<8x512xf32, #tpu.memory_space<vmem>>) attributes {dimension_semantics = [#tpu.dimension_semantics<parallel>, #tpu.dimension_semantics<parallel>, #tpu.dimension_semantics<arbitrary>], iteration_bounds = array<i64: 1, 1, 2>, scalar_prefetch = 0 : i64, scratch_operands = 0 : i64, tpu.core_type = #tpu.core_type<tc>, window_params = [{pipeline_mode = #tpu.pipeline_mode<synchronous>, transform_indices = @transform_0, window_bounds = array<i64: 8, 512>}, {transform_indices = @transform_1, window_bounds = array<i64: 8, 512>}, {transform_indices = @transform_2, window_bounds = array<i64: 8, 512>}, {transform_indices = @transform_3, window_bounds = array<i64: 8, 512>}, {transform_indices = @transform_4, window_bounds = array<i64: 8, 512>}, {transform_indices = @transform_5, window_bounds = array<i64: 8, 512>}, {transform_indices = @transform_6, window_bounds = array<i64: 8, 512>}]} {
    %c0 = arith.constant 0 : index
    %c0_0 = arith.constant 0 : index
    %0 = vector.load %arg3[%c0, %c0_0] : memref<8x512xf32, #tpu.memory_space<vmem>>, vector<8x512xf32>
    %1 = arith.sitofp %arg2 : i32 to f32
    %2 = vector.extract_strided_slice %0 {offsets = [0, 0], sizes = [4, 512], strides = [1, 1]} : vector<8x512xf32> to vector<4x512xf32>
    %3 = vector.extract_strided_slice %0 {offsets = [4, 0], sizes = [4, 512], strides = [1, 1]} : vector<8x512xf32> to vector<4x512xf32>
    %4 = vector.extract_strided_slice %0 {offsets = [0, 0], sizes = [4, 512], strides = [1, 1]} : vector<8x512xf32> to vector<4x512xf32>
    %5 = arith.subf %3, %4 : vector<4x512xf32>
    %6 = vector.broadcast %1 : f32 to vector<4x512xf32>
    %7 = arith.mulf %6, %5 : vector<4x512xf32>
    %8 = arith.addf %2, %7 : vector<4x512xf32>
    %9 = vector.extract_strided_slice %8 {offsets = [0, 0], sizes = [1, 512], strides = [1, 1]} : vector<4x512xf32> to vector<1x512xf32>
    %10 = vector.extract_strided_slice %8 {offsets = [1, 0], sizes = [1, 512], strides = [1, 1]} : vector<4x512xf32> to vector<1x512xf32>
    %11 = vector.extract_strided_slice %8 {offsets = [2, 0], sizes = [1, 512], strides = [1, 1]} : vector<4x512xf32> to vector<1x512xf32>
    %12 = vector.extract_strided_slice %8 {offsets = [3, 0], sizes = [1, 512], strides = [1, 1]} : vector<4x512xf32> to vector<1x512xf32>
    %c0_1 = arith.constant 0 : index
    %c0_2 = arith.constant 0 : index
    %13 = vector.load %arg4[%c0_1, %c0_2] : memref<8x512xf32, #tpu.memory_space<vmem>>, vector<8x512xf32>
    %c0_3 = arith.constant 0 : index
    %c0_4 = arith.constant 0 : index
    %14 = vector.load %arg5[%c0_3, %c0_4] : memref<8x512xf32, #tpu.memory_space<vmem>>, vector<8x512xf32>
    %c0_5 = arith.constant 0 : index
    %c0_6 = arith.constant 0 : index
    %15 = vector.load %arg6[%c0_5, %c0_6] : memref<8x512xf32, #tpu.memory_space<vmem>>, vector<8x512xf32>
    %c0_7 = arith.constant 0 : index
    %c0_8 = arith.constant 0 : index
    %16 = vector.load %arg7[%c0_7, %c0_8] : memref<8x512xf32, #tpu.memory_space<vmem>>, vector<8x512xf32>
    %17 = vector.broadcast %9 : vector<1x512xf32> to vector<8x512xf32>
    %18 = arith.mulf %17, %13 : vector<8x512xf32>
    %19 = vector.broadcast %11 : vector<1x512xf32> to vector<8x512xf32>
    %20 = arith.mulf %19, %15 : vector<8x512xf32>
    %21 = arith.subf %18, %20 : vector<8x512xf32>
    %22 = vector.broadcast %10 : vector<1x512xf32> to vector<8x512xf32>
    %23 = arith.mulf %22, %14 : vector<8x512xf32>
    %24 = arith.addf %21, %23 : vector<8x512xf32>
    %25 = vector.broadcast %12 : vector<1x512xf32> to vector<8x512xf32>
    %26 = arith.mulf %25, %16 : vector<8x512xf32>
    %27 = arith.subf %24, %26 : vector<8x512xf32>
    %c0_9 = arith.constant 0 : index
    %c0_10 = arith.constant 0 : index
    %28 = vector.load %arg8[%c0_9, %c0_10] : memref<8x512xf32, #tpu.memory_space<vmem>>, vector<8x512xf32>
    tpu.vector_store %arg8[%c0_9, %c0_10], %27 {strides = array<i32>} : memref<8x512xf32, #tpu.memory_space<vmem>>, vector<8x512xf32>,
    %29 = vector.broadcast %9 : vector<1x512xf32> to vector<8x512xf32>
    %30 = arith.mulf %29, %15 : vector<8x512xf32>
    %31 = vector.broadcast %11 : vector<1x512xf32> to vector<8x512xf32>
    %32 = arith.mulf %31, %13 : vector<8x512xf32>
    %33 = arith.addf %30, %32 : vector<8x512xf32>
    %34 = vector.broadcast %10 : vector<1x512xf32> to vector<8x512xf32>
    %35 = arith.mulf %34, %16 : vector<8x512xf32>
    %36 = arith.addf %33, %35 : vector<8x512xf32>
    %37 = vector.broadcast %12 : vector<1x512xf32> to vector<8x512xf32>
    %38 = arith.mulf %37, %14 : vector<8x512xf32>
    %39 = arith.addf %36, %38 : vector<8x512xf32>
    %c0_11 = arith.constant 0 : index
    %c0_12 = arith.constant 0 : index
    %40 = vector.load %arg9[%c0_11, %c0_12] : memref<8x512xf32, #tpu.memory_space<vmem>>, vector<8x512xf32>
    tpu.vector_store %arg9[%c0_11, %c0_12], %39 {strides = array<i32>} : memref<8x512xf32, #tpu.memory_space<vmem>>, vector<8x512xf32>,
    return
  }
  func.func @transform_0(%arg0: i32, %arg1: i32, %arg2: i32) -> (i32, i32) {
    %c0_i32 = arith.constant 0 : i32
    %c0_i32_0 = arith.constant 0 : i32
    %c0_i32_1 = arith.constant 0 : i32
    return %c0_i32, %c0_i32_0 : i32, i32
  }
  func.func @transform_1(%arg0: i32, %arg1: i32, %arg2: i32) -> (i32, i32) {
    %c0_i32 = arith.constant 0 : i32
    return %arg0, %arg1 : i32, i32
  }
  func.func @transform_2(%arg0: i32, %arg1: i32, %arg2: i32) -> (i32, i32) {
    %c1_i32 = arith.constant 1 : i32
    %0 = arith.addi %arg1, %c1_i32 : i32
    %c0_i32 = arith.constant 0 : i32
    return %arg0, %0 : i32, i32
  }
  func.func @transform_3(%arg0: i32, %arg1: i32, %arg2: i32) -> (i32, i32) {
    %c0_i32 = arith.constant 0 : i32
    return %arg0, %arg1 : i32, i32
  }
  func.func @transform_4(%arg0: i32, %arg1: i32, %arg2: i32) -> (i32, i32) {
    %c1_i32 = arith.constant 1 : i32
    %0 = arith.addi %arg1, %c1_i32 : i32
    %c0_i32 = arith.constant 0 : i32
    return %arg0, %0 : i32, i32
  }
  func.func @transform_5(%arg0: i32, %arg1: i32, %arg2: i32) -> (i32, i32) {
    %c1_i32 = arith.constant 1 : i32
    %0 = arith.muli %arg2, %c1_i32 : i32
    %1 = arith.addi %arg1, %0 : i32
    %c0_i32 = arith.constant 0 : i32
    return %arg0, %1 : i32, i32
  }
  func.func @transform_6(%arg0: i32, %arg1: i32, %arg2: i32) -> (i32, i32) {
    %c1_i32 = arith.constant 1 : i32
    %0 = arith.muli %arg2, %c1_i32 : i32
    %1 = arith.addi %arg1, %0 : i32
    %c0_i32 = arith.constant 0 : i32
    return %arg0, %1 : i32, i32
  }
}

</mosaic_0001>

<bundles_post_ra>
// kernel: custom-call.1
= control target key start
LH: loop header
LB: loop body
LE: loop exit
PB: predicated region body
PF: predicated region fallthrough
CT: control target
= control target key end

     0   :  { %s56_s0 = inlined_call_operand.hbm [shape: c64[2,2,8], index: 0, kind: input, shape index: {}]   ;;  %s57_s1 = inlined_call_operand.vmem [shape: f32[2,2,8], index: 1, kind: output, shape index: {}]  }
   0x1   :  { %s2_s8 = scalar_lea.hbm %s56_s0, 4 }
   0x2   :  { %3 = vsyncpa [#allocation0], 0  ;;  %s5_s9 = sshll.u32 %s2_s8, 4  ;;  %s7_s12 = sshll.u32 %s57_s1, 4  ;;  %s6_s9 = int_to_ptr.hbm [resolvable:$true] %s5_s9  ;;  %s8_s12 = int_to_ptr.vmem [resolvable:$true] %s7_s12 }
   0x3   :  { %10 = dma.hbm_to_vmem [thread:$0]  %s6_s9, 64, %s8_s12, [#allocation0] }
   0x4   :  { %38 = dma.done.wait [#allocation0], 64  }
   0x5   :  { %39 = vsyncadd [#allocation0], 4294967232 }
   0x6   :  { %13 = vsyncpa [#allocation0], 1 }

// kernel: custom-call
= control target key start
LH: loop header
LB: loop body
LE: loop exit
PB: predicated region body
PF: predicated region fallthrough
CT: control target
= control target key end

     0   :  { %2 = vsyncpa [#allocation0], 0  ;;  %s55_s0 = inlined_call_operand.hbm [shape: c64[2,2,8], index: 0, kind: input, shape index: {}]   ;;  %s56_s1 = inlined_call_operand.vmem [shape: f32[2,2,8], index: 1, kind: output, shape index: {}]  }
   0x1   :  { %s4_s8 = sshll.u32 %s55_s0, 4  ;;  %s6_s11 = sshll.u32 %s56_s1, 4  ;;  %s5_s8 = int_to_ptr.hbm [resolvable:$true] %s4_s8  ;;  %s7_s11 = int_to_ptr.vmem [resolvable:$true] %s6_s11 }
   0x2   :  { %9 = dma.hbm_to_vmem [thread:$0]  %s5_s8, 64, %s7_s11, [#allocation0] }
   0x3   :  { %37 = dma.done.wait [#allocation0], 64  }
   0x4   :  { %38 = vsyncadd [#allocation0], 4294967232 }
   0x5   :  { %12 = vsyncpa [#allocation0], 1 }

// kernel: tile.9
= control target key start
LH: loop header
LB: loop body
LE: loop exit
PB: predicated region body
PF: predicated region fallthrough
CT: control target
= control target key end

     0   :  { %vm93_vm0 = vcmask 1041409   ;;  %vm97_vm1 = vcmask 1042434   ;;  %vm101_vm2 = vcmask 1043459   ;;  %vm105_vm3 = vcmask 1044484   ;;  %s2733_s25 = smov 120   ;;  %s2734_s3 = smov 112   ;;  %s5016_s0 = inlined_call_operand.vmem [shape: f32[8,64,8], index: 0, kind: input, shape index: {}]   ;;  %s5017_s1 = inlined_call_operand.vmem [shape: f32[8,512], index: 1, kind: output, shape index: {}]  }
   0x1   :  { %vm109_vm4 = vcmask 1045509   ;;  %v2210_v0 = vld [vmem:[%s5016_s0 + $0x2f] sm:$0x1]   ;;  %vm113_vm5 = vcmask 1046534   ;;  %vm117_vm6 = vcmask 1047559   ;;  %s2735_s24 = smov 104  }
   0x2   :  { %v2211_v1 = vld [vmem:[%s5016_s0 + $0x6e] sm:$0x2]   ;;  %v2219_v23 = vld [vmem:[%s5016_s0 + $0x3f] sm:$0x1]   ;;  %v2254_v52 = vld [vmem:[%s5016_s0 + $0x3e] sm:$0x1]  }
   0x3   :  { %v2212_v2 = vld [vmem:[%s5016_s0 + $0xad] sm:$0x4]   ;;  %v163_v4 = vsel %vm93_vm0, %v2211_v1, %v2210_v0  ;;  %v2220_v24 = vld [vmem:[%s5016_s0 + $0x7e] sm:$0x2]   ;;  %v2255_v53 = vld [vmem:[%s5016_s0 + $0x7d] sm:$0x2]  }
   0x4   :  { %v2213_v3 = vld [vmem:[%s5016_s0 + $0xec] sm:$0x8]   ;;  %v167_v7 = vsel %vm97_vm1, %v2212_v2, %v163_v4  ;;  %v2221_v25 = vld [vmem:[%s5016_s0 + $0xbd] sm:$0x4]   ;;  %v198_v29 = vsel %vm93_vm0, %v2220_v24, %v2219_v23  ;;  %v337_v56 = vsel %vm93_vm0, %v2255_v53, %v2254_v52  ;;  %v2256_v57 = vld [vmem:[%s5016_s0 + $0xbc] sm:$0x4]  }
   0x5   :  { %v2214_v5 = vld [vmem:[%s5016_s0 + $0x12b] sm:$0x10]   ;;  %v171_v11 = vsel %vm101_vm2, %v2213_v3, %v167_v7  ;;  %v2222_v30 = vld [vmem:[%s5016_s0 + $0xfc] sm:$0x8]   ;;  %v202_v34 = vsel %vm97_vm1, %v2221_v25, %v198_v29  ;;  %v2257_v58 = vld [vmem:[%s5016_s0 + $0xfb] sm:$0x8]   ;;  %v341_v62 = vsel %vm97_vm1, %v2256_v57, %v337_v56 }
   0x6   :  { %v2215_v6 = vld [vmem:[%s5016_s0 + $0x16a] sm:$0x20]   ;;  %v175_v16 = vsel %vm105_vm3, %v2214_v5, %v171_v11  ;;  %v2223_v31 = vld [vmem:[%s5016_s0 + $0x13b] sm:$0x10]   ;;  %v206_v39 = vsel %vm101_vm2, %v2222_v30, %v202_v34  ;;  %v2258_v59 = vld [vmem:[%s5016_s0 + $0x13a] sm:$0x10]   ;;  %v345_v2 = vsel %vm101_vm2, %v2257_v58, %v341_v62 }
   0x7   :  { %v2216_v8 = vld [vmem:[%s5016_s0 + $0x1a9] sm:$0x40]   ;;  %v179_v21 = vsel %vm109_vm4, %v2215_v6, %v175_v16  ;;  %v2224_v35 = vld [vmem:[%s5016_s0 + $0x17a] sm:$0x20]   ;;  %v210_v44 = vsel %vm105_vm3, %v2223_v31, %v206_v39  ;;  %v2259_v63 = vld [vmem:[%s5016_s0 + $0x179] sm:$0x20]   ;;  %v349_v7 = vsel %vm105_vm3, %v2258_v59, %v345_v2 }
   0x8   :  { %v2193_v9 = vld [vmem:[%s5016_s0 + $0xf] sm:$0x1]   ;;  %v183_v26 = vsel %vm113_vm5, %v2216_v8, %v179_v21  ;;  %v2225_v36 = vld [vmem:[%s5016_s0 + $0x1b9] sm:$0x40]   ;;  %v214_v49 = vsel %vm109_vm4, %v2224_v35, %v210_v44  ;;  %v2245_v3 = vld [vmem:[%s5016_s0 + $0x2e] sm:$0x1]  }
   0x9   :  { %v2194_v10 = vld [vmem:[%s5016_s0 + $0x4e] sm:$0x2]   ;;  %v2201_v37 = vld [vmem:[%s5016_s0 + $0x1f] sm:$0x1]   ;;  %v218_v54 = vsel %vm113_vm5, %v2225_v36, %v214_v49  ;;  %v2246_v4 = vld [vmem:[%s5016_s0 + $0x6d] sm:$0x2]  }
   0xa   :  { %v94_v12 = vsel %vm93_vm0, %v2194_v10, %v2193_v9  ;;  %v2195_v13 = vld [vmem:[%s5016_s0 + $0x8d] sm:$0x4]   ;;  %v2202_v40 = vld [vmem:[%s5016_s0 + $0x5e] sm:$0x2]   ;;  %v2247_v5 = vld [vmem:[%s5016_s0 + $0xac] sm:$0x4]   ;;  %v302_v8 = vsel %vm93_vm0, %v2246_v4, %v2245_v3 }
   0xb   :  { %v2196_v14 = vld [vmem:[%s5016_s0 + $0xcc] sm:$0x8]   ;;  %v98_v18 = vsel %vm97_vm1, %v2195_v13, %v94_v12  ;;  %v2203_v41 = vld [vmem:[%s5016_s0 + $0x9d] sm:$0x4]   ;;  %v128_v46 = vsel %vm93_vm0, %v2202_v40, %v2201_v37  ;;  %v2248_v9 = vld [vmem:[%s5016_s0 + $0xeb] sm:$0x8]   ;;  %v353_v12 = vsel %vm109_vm4, %v2259_v63, %v349_v7 }
   0xc   :  { %v2197_v15 = vld [vmem:[%s5016_s0 + $0x10b] sm:$0x10]   ;;  %v102_v22 = vsel %vm101_vm2, %v2196_v14, %v98_v18  ;;  %v2204_v42 = vld [vmem:[%s5016_s0 + $0xdc] sm:$0x8]   ;;  %v132_v50 = vsel %vm97_vm1, %v2203_v41, %v128_v46  ;;  %v2249_v10 = vld [vmem:[%s5016_s0 + $0x12a] sm:$0x10]   ;;  %v306_v14 = vsel %vm97_vm1, %v2247_v5, %v302_v8 }
   0xd   :  { %v2217_v17 = vld [vmem:[%s5016_s0 + $0x1e8] sm:$0x80]   ;;  %v106_v27 = vsel %vm105_vm3, %v2197_v15, %v102_v22  ;;  %v2226_v45 = vld [vmem:[%s5016_s0 + $0x1f8] sm:$0x80]   ;;  %v136_v55 = vsel %vm101_vm2, %v2204_v42, %v132_v50  ;;  %v2260_v13 = vld [vmem:[%s5016_s0 + $0x1b8] sm:$0x40]   ;;  %v310_v18 = vsel %vm101_vm2, %v2248_v9, %v306_v14 }
   0xe   :  { %v2198_v19 = vld [vmem:[%s5016_s0 + $0x14a] sm:$0x20]   ;;  %v187_v32 = vsel %vm117_vm6, %v2217_v17, %v183_v26  ;;  %v2205_v47 = vld [vmem:[%s5016_s0 + $0x11b] sm:$0x10]   ;;  %v222_v0 = vsel %vm117_vm6, %v2226_v45, %v218_v54  ;;  %v2250_v15 = vld [vmem:[%s5016_s0 + $0x169] sm:$0x20]   ;;  %v314_v22 = vsel %vm105_vm3, %v2249_v10, %v310_v18 }
   0xf   :  { %v2199_v20 = vld [vmem:[%s5016_s0 + $0x189] sm:$0x40]   ;;  %v110_v33 = vsel %vm109_vm4, %v2198_v19, %v106_v27  ;;  %188 = vrot.lane.b32.xlu1 %v187_v32, %s2733_s25  ;;  %v2206_v48 = vld [vmem:[%s5016_s0 + $0x15a] sm:$0x20]   ;;  %v140_v60 = vsel %vm105_vm3, %v2205_v47, %v136_v55  ;;  %v2228_v16 = vld [vmem:[%s5016_s0 + $0xe] sm:$0x1]   ;;  %v357_v27 = vsel %vm113_vm5, %v2260_v13, %v353_v12 }
  0x10   :  { %v2200_v28 = vld [vmem:[%s5016_s0 + $0x1c8] sm:$0x80]   ;;  %v114_v38 = vsel %vm113_vm5, %v2199_v20, %v110_v33  ;;  %v2207_v51 = vld [vmem:[%s5016_s0 + $0x199] sm:$0x40]   ;;  %v144_v1 = vsel %vm109_vm4, %v2206_v48, %v140_v60  ;;  %v2261_v17 = vld [vmem:[%s5016_s0 + $0x1f7] sm:$0x80]  }
  0x11   :  { %v118_v43 = vsel %vm117_vm6, %v2200_v28, %v114_v38  ;;  %v2208_v61 = vld [vmem:[%s5016_s0 + $0x1d8] sm:$0x80]   ;;  %v148_v6 = vsel %vm113_vm5, %v2207_v51, %v144_v1  ;;  %v2229_v19 = vld [vmem:[%s5016_s0 + $0x4d] sm:$0x2]   ;;  %v318_v28 = vsel %vm109_vm4, %v2250_v15, %v314_v22  ;;  %v2280_v31 = vld [vmem:[%s5016_s0 + $0x2d] sm:$0x1]   ;;  %v361_v44 = vsel %vm117_vm6, %v2261_v17, %v357_v27 }
  0x12   :  { %119 = vrot.lane.b32.xlu0 %v118_v43, %s2733_s25  ;;  %v152_v11 = vsel %vm117_vm6, %v2208_v61, %v148_v6  ;;  %v2230_v20 = vld [vmem:[%s5016_s0 + $0x8c] sm:$0x4]   ;;  %v233_v24 = vsel %vm93_vm0, %v2229_v19, %v2228_v16  ;;  %v2281_v32 = vld [vmem:[%s5016_s0 + $0x6c] sm:$0x2]   ;;  %v2271_v47 = vld [vmem:[%s5016_s0 + $0x1d] sm:$0x1]  }
  0x13   :  { %v2231_v21 = vld [vmem:[%s5016_s0 + $0xcb] sm:$0x8]   ;;  %v237_v29 = vsel %vm97_vm1, %v2230_v20, %v233_v24  ;;  %v441_v34 = vsel %vm93_vm0, %v2281_v32, %v2280_v31  ;;  %v2282_v35 = vld [vmem:[%s5016_s0 + $0xab] sm:$0x4]   ;;  %v2272_v48 = vld [vmem:[%s5016_s0 + $0x5c] sm:$0x2]  }
  0x14   :  { %v2251_v23 = vld [vmem:[%s5016_s0 + $0x1a8] sm:$0x40]   ;;  %v241_v33 = vsel %vm101_vm2, %v2231_v21, %v237_v29  ;;  %v2283_v36 = vld [vmem:[%s5016_s0 + $0xea] sm:$0x8]   ;;  %v445_v42 = vsel %vm97_vm1, %v2282_v35, %v441_v34  ;;  %v2273_v49 = vld [vmem:[%s5016_s0 + $0x9b] sm:$0x4]   ;;  %v406_v52 = vsel %vm93_vm0, %v2272_v48, %v2271_v47 }
  0x15   :  { %v2232_v25 = vld [vmem:[%s5016_s0 + $0x10a] sm:$0x10]   ;;  %v2284_v37 = vld [vmem:[%s5016_s0 + $0x129] sm:$0x10]   ;;  %v322_v38 = vsel %vm113_vm5, %v2251_v23, %v318_v28  ;;  %v449_v46 = vsel %vm101_vm2, %v2283_v36, %v445_v42  ;;  %v2274_v53 = vld [vmem:[%s5016_s0 + $0xda] sm:$0x8]   ;;  %v410_v59 = vsel %vm97_vm1, %v2273_v49, %v406_v52 }
  0x16   :  { %v2233_v26 = vld [vmem:[%s5016_s0 + $0x149] sm:$0x20]   ;;  %v245_v40 = vsel %vm105_vm3, %v2232_v25, %v241_v33  ;;  %v2285_v43 = vld [vmem:[%s5016_s0 + $0x168] sm:$0x20]   ;;  %v453_v51 = vsel %vm105_vm3, %v2284_v37, %v449_v46  ;;  %v2275_v54 = vld [vmem:[%s5016_s0 + $0x119] sm:$0x10]   ;;  %v414_v63 = vsel %vm101_vm2, %v2274_v53, %v410_v59 }
  0x17   :  { %223 = vrot.lane.b32.xlu1 %v222_v0, %s2733_s25  ;;  %v2234_v30 = vld [vmem:[%s5016_s0 + $0x188] sm:$0x40]   ;;  %v249_v45 = vsel %vm109_vm4, %v2233_v26, %v245_v40  ;;  %v457_v57 = vsel %vm109_vm4, %v2285_v43, %v453_v51  ;;  %v2286_v58 = vld [vmem:[%s5016_s0 + $0x1a7] sm:$0x40]   ;;  %v2276_v60 = vld [vmem:[%s5016_s0 + $0x158] sm:$0x20]   ;;  %v418_v2 = vsel %vm105_vm3, %v2275_v54, %v414_v63 }
  0x18   :  { %v2252_v39 = vld [vmem:[%s5016_s0 + $0x1e7] sm:$0x80]   ;;  %v253_v50 = vsel %vm113_vm5, %v2234_v30, %v249_v45  ;;  %v2236_v61 = vld [vmem:[%s5016_s0 + $0x1e] sm:$0x1]   ;;  %v2287_v62 = vld [vmem:[%s5016_s0 + $0x1e6] sm:$0x80]   ;;  %v461_v7 = vsel %vm113_vm5, %v2286_v58, %v457_v57  ;;  %v422_v8 = vsel %vm109_vm4, %v2276_v60, %v418_v2 }
  0x19   :  { %v2235_v41 = vld [vmem:[%s5016_s0 + $0x1c7] sm:$0x80]   ;;  %v326_v55 = vsel %vm117_vm6, %v2252_v39, %v322_v38  ;;  %v2237_v0 = vld [vmem:[%s5016_s0 + $0x5d] sm:$0x2]   ;;  %v2277_v3 = vld [vmem:[%s5016_s0 + $0x197] sm:$0x40]   ;;  %v465_v23 = vsel %vm117_vm6, %v2287_v62, %v461_v7 }
  0x1a   :  { %153 = vrot.lane.b32.xlu0 %v152_v11, %s2733_s25  ;;  %v257_v56 = vsel %vm117_vm6, %v2235_v41, %v253_v50  ;;  %v2238_v1 = vld [vmem:[%s5016_s0 + $0x9c] sm:$0x4]   ;;  %v267_v4 = vsel %vm93_vm0, %v2237_v0, %v2236_v61  ;;  %v2306_v12 = vld [vmem:[%s5016_s0 + $0x1c] sm:$0x1]   ;;  %v426_v17 = vsel %vm113_vm5, %v2277_v3, %v422_v8  ;;  %v2278_v18 = vld [vmem:[%s5016_s0 + $0x1d6] sm:$0x80]  }
  0x1b   :  { %258 = vrot.lane.b32.xlu2 %v257_v56, %s2734_s3  ;;  %v2239_v5 = vld [vmem:[%s5016_s0 + $0xdb] sm:$0x8]   ;;  %v271_v9 = vsel %vm97_vm1, %v2238_v1, %v267_v4  ;;  %v2307_v14 = vld [vmem:[%s5016_s0 + $0x5b] sm:$0x2]   ;;  %v2298_v27 = vld [vmem:[%s5016_s0 + $0xc] sm:$0x1]   ;;  %v430_v35 = vsel %vm117_vm6, %v2278_v18, %v426_v17 }
  0x1c   :  { %v2240_v6 = vld [vmem:[%s5016_s0 + $0x11a] sm:$0x10]   ;;  %v275_v13 = vsel %vm101_vm2, %v2239_v5, %v271_v9  ;;  %v2308_v15 = vld [vmem:[%s5016_s0 + $0x9a] sm:$0x4]   ;;  %v545_v21 = vsel %vm93_vm0, %v2307_v14, %v2306_v12  ;;  %v2299_v28 = vld [vmem:[%s5016_s0 + $0x4b] sm:$0x2]  }
  0x1d   :  { %v2241_v10 = vld [vmem:[%s5016_s0 + $0x159] sm:$0x20]   ;;  %v2309_v16 = vld [vmem:[%s5016_s0 + $0xd9] sm:$0x8]   ;;  %v279_v19 = vsel %vm105_vm3, %v2240_v6, %v275_v13  ;;  %v549_v25 = vsel %vm97_vm1, %v2308_v15, %v545_v21  ;;  %v511_v31 = vsel %vm93_vm0, %v2299_v28, %v2298_v27  ;;  %v2300_v32 = vld [vmem:[%s5016_s0 + $0x8a] sm:$0x4]  }
  0x1e   :  { %v2242_v11 = vld [vmem:[%s5016_s0 + $0x198] sm:$0x40]   ;;  %v2310_v22 = vld [vmem:[%s5016_s0 + $0x118] sm:$0x10]   ;;  %v283_v24 = vsel %vm109_vm4, %v2241_v10, %v279_v19  ;;  %v553_v30 = vsel %vm101_vm2, %v2309_v16, %v549_v25  ;;  %v2301_v33 = vld [vmem:[%s5016_s0 + $0xc9] sm:$0x8]   ;;  %v515_v39 = vsel %vm97_vm1, %v2300_v32, %v511_v31 }
  0x1f   :  { %362 = vrot.lane.b32.xlu1 %v361_v44, %s2734_s3  ;;  %v2243_v20 = vld [vmem:[%s5016_s0 + $0x1d7] sm:$0x80]   ;;  %v2311_v26 = vld [vmem:[%s5016_s0 + $0x157] sm:$0x20]   ;;  %v287_v29 = vsel %vm113_vm5, %v2242_v11, %v283_v24  ;;  %v2302_v34 = vld [vmem:[%s5016_s0 + $0x108] sm:$0x10]   ;;  %v557_v37 = vsel %vm105_vm3, %v2310_v22, %v553_v30  ;;  %v519_v44 = vsel %vm101_vm2, %v2301_v33, %v515_v39 }
  0x20   :  { %v291_v36 = vsel %vm117_vm6, %v2243_v20, %v287_v29  ;;  %v2312_v38 = vld [vmem:[%s5016_s0 + $0x196] sm:$0x40]   ;;  %v2303_v40 = vld [vmem:[%s5016_s0 + $0x147] sm:$0x20]   ;;  %v561_v42 = vsel %vm109_vm4, %v2311_v26, %v557_v37  ;;  %v2263_v45 = vld [vmem:[%s5016_s0 + $0xd] sm:$0x1]   ;;  %v523_v47 = vsel %vm105_vm3, %v2302_v34, %v519_v44 }
  0x21   :  { %v2304_v41 = vld [vmem:[%s5016_s0 + $0x186] sm:$0x40]   ;;  %v2313_v43 = vld [vmem:[%s5016_s0 + $0x1d5] sm:$0x80]   ;;  %v2264_v46 = vld [vmem:[%s5016_s0 + $0x4c] sm:$0x2]   ;;  %v565_v52 = vsel %vm113_vm5, %v2312_v38, %v561_v42  ;;  %v527_v53 = vsel %vm109_vm4, %v2303_v40, %v523_v47 }
  0x22   :  { %327 = vrot.lane.b32.xlu0 %v326_v55, %s2734_s3  ;;  %v372_v48 = vsel %vm93_vm0, %v2264_v46, %v2263_v45  ;;  %v2265_v49 = vld [vmem:[%s5016_s0 + $0x8b] sm:$0x4]   ;;  %v2305_v54 = vld [vmem:[%s5016_s0 + $0x1c5] sm:$0x80]   ;;  %v2333_v59 = vld [vmem:[%s5016_s0 + $0xb] sm:$0x1]   ;;  %v531_v62 = vsel %vm113_vm5, %v2304_v41, %v527_v53  ;;  %v569_v4 = vsel %vm117_vm6, %v2313_v43, %v565_v52 }
  0x23   :  { %292 = vrot.lane.b32.xlu2 %v291_v36, %s2734_s3  ;;  %v2266_v50 = vld [vmem:[%s5016_s0 + $0xca] sm:$0x8]   ;;  %v376_v55 = vsel %vm97_vm1, %v2265_v49, %v372_v48  ;;  %v2334_v60 = vld [vmem:[%s5016_s0 + $0x4a] sm:$0x2]   ;;  %v2324_v8 = vld [vmem:[%s5016_s0 + $0x3c] sm:$0x1]   ;;  %v535_v14 = vsel %vm117_vm6, %v2305_v54, %v531_v62 }
  0x24   :  { %v2267_v51 = vld [vmem:[%s5016_s0 + $0x109] sm:$0x10]   ;;  %v380_v58 = vsel %vm101_vm2, %v2266_v50, %v376_v55  ;;  %v2335_v61 = vld [vmem:[%s5016_s0 + $0x89] sm:$0x4]   ;;  %v650_v1 = vsel %vm93_vm0, %v2334_v60, %v2333_v59  ;;  %v2325_v11 = vld [vmem:[%s5016_s0 + $0x7b] sm:$0x2]  }
  0x25   :  { %v2268_v56 = vld [vmem:[%s5016_s0 + $0x148] sm:$0x20]   ;;  %v384_v63 = vsel %vm105_vm3, %v2267_v51, %v380_v58  ;;  %v2336_v2 = vld [vmem:[%s5016_s0 + $0xc8] sm:$0x8]   ;;  %v654_v6 = vsel %vm97_vm1, %v2335_v61, %v650_v1  ;;  %v2326_v12 = vld [vmem:[%s5016_s0 + $0xba] sm:$0x4]   ;;  %v615_v18 = vsel %vm93_vm0, %v2325_v11, %v2324_v8 }
  0x26   :  { %v2269_v57 = vld [vmem:[%s5016_s0 + $0x187] sm:$0x40]   ;;  %v2337_v3 = vld [vmem:[%s5016_s0 + $0x107] sm:$0x10]   ;;  %v388_v5 = vsel %vm109_vm4, %v2268_v56, %v384_v63  ;;  %v658_v10 = vsel %vm101_vm2, %v2336_v2, %v654_v6  ;;  %v2327_v13 = vld [vmem:[%s5016_s0 + $0xf9] sm:$0x8]  }
  0x27   :  { %466 = vrot.lane.b32.xlu1 %v465_v23, %s2735_s24  ;;  %v2270_v0 = vld [vmem:[%s5016_s0 + $0x1c6] sm:$0x80]   ;;  %v2338_v7 = vld [vmem:[%s5016_s0 + $0x146] sm:$0x20]   ;;  %v392_v9 = vsel %vm113_vm5, %v2269_v57, %v388_v5  ;;  %v662_v16 = vsel %vm105_vm3, %v2337_v3, %v658_v10  ;;  %v2328_v19 = vld [vmem:[%s5016_s0 + $0x138] sm:$0x10]   ;;  %v619_v23 = vsel %vm97_vm1, %v2326_v12, %v615_v18 }
  0x28   :  { %v396_v15 = vsel %vm117_vm6, %v2270_v0, %v392_v9  ;;  %v2339_v17 = vld [vmem:[%s5016_s0 + $0x185] sm:$0x40]   ;;  %v2329_v20 = vld [vmem:[%s5016_s0 + $0x177] sm:$0x20]   ;;  %s2736_s14 = smov 96   ;;  %v666_v21 = vsel %vm109_vm4, %v2338_v7, %v662_v16  ;;  %v623_v26 = vsel %vm101_vm2, %v2327_v13, %v619_v23  ;;  %s2737_s6 = smov 88  }
  0x29   :  { %v2340_v22 = vld [vmem:[%s5016_s0 + $0x1c4] sm:$0x80]   ;;  %v2330_v24 = vld [vmem:[%s5016_s0 + $0x1b6] sm:$0x40]   ;;  %v2289_v25 = vld [vmem:[%s5016_s0 + $0x3d] sm:$0x1]   ;;  %v670_v30 = vsel %vm113_vm5, %v2339_v17, %v666_v21  ;;  %v627_v31 = vsel %vm105_vm3, %v2328_v19, %v623_v26 }
  0x2a   :  { %431 = vrot.lane.b32.xlu0 %v430_v35, %s2735_s24  ;;  %v2290_v27 = vld [vmem:[%s5016_s0 + $0x7c] sm:$0x2]   ;;  %v2331_v32 = vld [vmem:[%s5016_s0 + $0x1f5] sm:$0x80]   ;;  %v631_v36 = vsel %vm109_vm4, %v2329_v20, %v627_v31  ;;  %v2359_v39 = vld [vmem:[%s5016_s0 + $0x3b] sm:$0x1]   ;;  %v674_v47 = vsel %vm117_vm6, %v2340_v22, %v670_v30 }
  0x2b   :  { %397 = vrot.lane.b32.xlu2 %v396_v15, %s2735_s24  ;;  %v2291_v28 = vld [vmem:[%s5016_s0 + $0xbb] sm:$0x4]   ;;  %v476_v33 = vsel %vm93_vm0, %v2290_v27, %v2289_v25  ;;  %v2360_v40 = vld [vmem:[%s5016_s0 + $0x7a] sm:$0x2]   ;;  %v635_v41 = vsel %vm113_vm5, %v2330_v24, %v631_v36  ;;  %v2350_v54 = vld [vmem:[%s5016_s0 + $0x2b] sm:$0x1]  }
  0x2c   :  { %v2292_v29 = vld [vmem:[%s5016_s0 + $0xfa] sm:$0x8]   ;;  %v480_v37 = vsel %vm97_vm1, %v2291_v28, %v476_v33  ;;  %v754_v43 = vsel %vm93_vm0, %v2360_v40, %v2359_v39  ;;  %v2361_v44 = vld [vmem:[%s5016_s0 + $0xb9] sm:$0x4]   ;;  %v2351_v55 = vld [vmem:[%s5016_s0 + $0x6a] sm:$0x2]   ;;  %v639_v57 = vsel %vm117_vm6, %v2331_v32, %v635_v41 }
  0x2d   :  { %v2293_v34 = vld [vmem:[%s5016_s0 + $0x139] sm:$0x10]   ;;  %v484_v42 = vsel %vm101_vm2, %v2292_v29, %v480_v37  ;;  %v2362_v45 = vld [vmem:[%s5016_s0 + $0xf8] sm:$0x8]   ;;  %v758_v50 = vsel %vm97_vm1, %v2361_v44, %v754_v43  ;;  %v2352_v56 = vld [vmem:[%s5016_s0 + $0xa9] sm:$0x4]   ;;  %v719_v61 = vsel %vm93_vm0, %v2351_v55, %v2350_v54 }
  0x2e   :  { %v2294_v35 = vld [vmem:[%s5016_s0 + $0x178] sm:$0x20]   ;;  %v2363_v46 = vld [vmem:[%s5016_s0 + $0x137] sm:$0x10]   ;;  %v488_v48 = vsel %vm105_vm3, %v2293_v34, %v484_v42  ;;  %v762_v53 = vsel %vm101_vm2, %v2362_v45, %v758_v50  ;;  %v2353_v62 = vld [vmem:[%s5016_s0 + $0xe8] sm:$0x8]   ;;  %v723_v3 = vsel %vm97_vm1, %v2352_v56, %v719_v61 }
  0x2f   :  { %570 = vrot.lane.b32.xlu1 %v569_v4, %s2736_s14  ;;  %v2295_v38 = vld [vmem:[%s5016_s0 + $0x1b7] sm:$0x40]   ;;  %v2364_v51 = vld [vmem:[%s5016_s0 + $0x176] sm:$0x20]   ;;  %v492_v52 = vsel %vm109_vm4, %v2294_v35, %v488_v48  ;;  %v766_v59 = vsel %vm105_vm3, %v2363_v46, %v762_v53  ;;  %v2354_v63 = vld [vmem:[%s5016_s0 + $0x127] sm:$0x10]   ;;  %v727_v7 = vsel %vm101_vm2, %v2353_v62, %v723_v3 }
  0x30   :  { %v2296_v49 = vld [vmem:[%s5016_s0 + $0x1f6] sm:$0x80]   ;;  %v496_v58 = vsel %vm113_vm5, %v2295_v38, %v492_v52  ;;  %v2365_v60 = vld [vmem:[%s5016_s0 + $0x1b5] sm:$0x40]   ;;  %v770_v1 = vsel %vm109_vm4, %v2364_v51, %v766_v59  ;;  %v2355_v4 = vld [vmem:[%s5016_s0 + $0x166] sm:$0x20]   ;;  %v731_v12 = vsel %vm105_vm3, %v2354_v63, %v727_v7 }
  0x31   :  { %v500_v0 = vsel %vm117_vm6, %v2296_v49, %v496_v58  ;;  %v2366_v2 = vld [vmem:[%s5016_s0 + $0x1f4] sm:$0x80]   ;;  %v2356_v5 = vld [vmem:[%s5016_s0 + $0x1a5] sm:$0x40]   ;;  %v2315_v6 = vld [vmem:[%s5016_s0 + $0x2c] sm:$0x1]   ;;  %v774_v11 = vsel %vm113_vm5, %v2365_v60, %v770_v1  ;;  %v735_v17 = vsel %vm109_vm4, %v2355_v4, %v731_v12 }
  0x32   :  { %536 = vrot.lane.b32.xlu0 %v535_v14, %s2736_s14  ;;  %v2316_v8 = vld [vmem:[%s5016_s0 + $0x6b] sm:$0x2]   ;;  %v2357_v13 = vld [vmem:[%s5016_s0 + $0x1e4] sm:$0x80]   ;;  %v2385_v20 = vld [vmem:[%s5016_s0 + $0x2a] sm:$0x1]   ;;  %v739_v22 = vsel %vm113_vm5, %v2356_v5, %v735_v17  ;;  %v778_v28 = vsel %vm117_vm6, %v2366_v2, %v774_v11 }
  0x33   :  { %501 = vrot.lane.b32.xlu2 %v500_v0, %s2735_s24  ;;  %v2317_v9 = vld [vmem:[%s5016_s0 + $0xaa] sm:$0x4]   ;;  %v580_v14 = vsel %vm93_vm0, %v2316_v8, %v2315_v6  ;;  %v2386_v21 = vld [vmem:[%s5016_s0 + $0x69] sm:$0x2]   ;;  %v2376_v35 = vld [vmem:[%s5016_s0 + $0x1a] sm:$0x1]   ;;  %v743_v38 = vsel %vm117_vm6, %v2357_v13, %v739_v22 }
  0x34   :  { %v2318_v10 = vld [vmem:[%s5016_s0 + $0xe9] sm:$0x8]   ;;  %v584_v18 = vsel %vm97_vm1, %v2317_v9, %v580_v14  ;;  %v858_v24 = vsel %vm93_vm0, %v2386_v21, %v2385_v20  ;;  %v2387_v25 = vld [vmem:[%s5016_s0 + $0xa8] sm:$0x4]   ;;  %v2377_v36 = vld [vmem:[%s5016_s0 + $0x59] sm:$0x2]  }
  0x35   :  { %v2319_v15 = vld [vmem:[%s5016_s0 + $0x128] sm:$0x10]   ;;  %v588_v23 = vsel %vm101_vm2, %v2318_v10, %v584_v18  ;;  %v2388_v26 = vld [vmem:[%s5016_s0 + $0xe7] sm:$0x8]   ;;  %v862_v31 = vsel %vm97_vm1, %v2387_v25, %v858_v24  ;;  %v2378_v37 = vld [vmem:[%s5016_s0 + $0x98] sm:$0x4]   ;;  %v823_v42 = vsel %vm93_vm0, %v2377_v36, %v2376_v35 }
  0x36   :  { %v2320_v16 = vld [vmem:[%s5016_s0 + $0x167] sm:$0x20]   ;;  %v2389_v27 = vld [vmem:[%s5016_s0 + $0x126] sm:$0x10]   ;;  %v592_v29 = vsel %vm105_vm3, %v2319_v15, %v588_v23  ;;  %v866_v34 = vsel %vm101_vm2, %v2388_v26, %v862_v31  ;;  %v2379_v43 = vld [vmem:[%s5016_s0 + $0xd7] sm:$0x8]   ;;  %v827_v48 = vsel %vm97_vm1, %v2378_v37, %v823_v42 }
  0x37   :  { %675 = vrot.lane.b32.xlu1 %v674_v47, %s2737_s6  ;;  %v2321_v19 = vld [vmem:[%s5016_s0 + $0x1a6] sm:$0x40]   ;;  %v2390_v32 = vld [vmem:[%s5016_s0 + $0x165] sm:$0x20]   ;;  %v596_v33 = vsel %vm109_vm4, %v2320_v16, %v592_v29  ;;  %v870_v40 = vsel %vm105_vm3, %v2389_v27, %v866_v34  ;;  %v2380_v44 = vld [vmem:[%s5016_s0 + $0x116] sm:$0x10]   ;;  %v831_v52 = vsel %vm101_vm2, %v2379_v43, %v827_v48 }
  0x38   :  { %v2322_v30 = vld [vmem:[%s5016_s0 + $0x1e5] sm:$0x80]   ;;  %v600_v39 = vsel %vm113_vm5, %v2321_v19, %v596_v33  ;;  %v2391_v41 = vld [vmem:[%s5016_s0 + $0x1a4] sm:$0x40]   ;;  %v874_v46 = vsel %vm109_vm4, %v2390_v32, %v870_v40  ;;  %v2381_v49 = vld [vmem:[%s5016_s0 + $0x155] sm:$0x20]  }
  0x39   :  { %v604_v45 = vsel %vm117_vm6, %v2322_v30, %v600_v39  ;;  %v2392_v47 = vld [vmem:[%s5016_s0 + $0x1e3] sm:$0x80]   ;;  %v2382_v50 = vld [vmem:[%s5016_s0 + $0x194] sm:$0x40]   ;;  %v2341_v51 = vld [vmem:[%s5016_s0 + $0x1b] sm:$0x1]   ;;  %v878_v56 = vsel %vm113_vm5, %v2391_v41, %v874_v46 }
  0x3a   :  { %640 = vrot.lane.b32.xlu0 %v639_v57, %s2736_s14  ;;  %v2342_v53 = vld [vmem:[%s5016_s0 + $0x5a] sm:$0x2]   ;;  %v835_v57 = vsel %vm105_vm3, %v2380_v44, %v831_v52  ;;  %v2383_v58 = vld [vmem:[%s5016_s0 + $0x1d3] sm:$0x80]   ;;  %v2411_v1 = vld [vmem:[%s5016_s0 + $0x19] sm:$0x1]   ;;  %v882_v9 = vsel %vm117_vm6, %v2392_v47, %v878_v56 }
  0x3b   :  { %605 = vrot.lane.b32.xlu2 %v604_v45, %s2736_s14  ;;  %v2343_v54 = vld [vmem:[%s5016_s0 + $0x99] sm:$0x4]   ;;  %v684_v59 = vsel %vm93_vm0, %v2342_v53, %v2341_v51  ;;  %v839_v62 = vsel %vm109_vm4, %v2381_v49, %v835_v57  ;;  %v2412_v2 = vld [vmem:[%s5016_s0 + $0x58] sm:$0x2]   ;;  %v2403_v16 = vld [vmem:[%s5016_s0 + $0x9] sm:$0x1]  }
  0x3c   :  { %v2344_v55 = vld [vmem:[%s5016_s0 + $0xd8] sm:$0x8]   ;;  %v688_v63 = vsel %vm97_vm1, %v2343_v54, %v684_v59  ;;  %v843_v3 = vsel %vm113_vm5, %v2382_v50, %v839_v62  ;;  %v962_v5 = vsel %vm93_vm0, %v2412_v2, %v2411_v1  ;;  %v2413_v6 = vld [vmem:[%s5016_s0 + $0x97] sm:$0x4]   ;;  %v2404_v17 = vld [vmem:[%s5016_s0 + $0x48] sm:$0x2]  }
  0x3d   :  { %v2345_v60 = vld [vmem:[%s5016_s0 + $0x117] sm:$0x10]   ;;  %v692_v4 = vsel %vm101_vm2, %v2344_v55, %v688_v63  ;;  %v2414_v7 = vld [vmem:[%s5016_s0 + $0xd6] sm:$0x8]   ;;  %v966_v12 = vsel %vm97_vm1, %v2413_v6, %v962_v5  ;;  %v2405_v18 = vld [vmem:[%s5016_s0 + $0x87] sm:$0x4]   ;;  %v847_v19 = vsel %vm117_vm6, %v2383_v58, %v843_v3  ;;  %v928_v23 = vsel %vm93_vm0, %v2404_v17, %v2403_v16 }
  0x3e   :  { %v2346_v61 = vld [vmem:[%s5016_s0 + $0x156] sm:$0x20]   ;;  %v2415_v8 = vld [vmem:[%s5016_s0 + $0x115] sm:$0x10]   ;;  %v696_v10 = vsel %vm105_vm3, %v2345_v60, %v692_v4  ;;  %v970_v15 = vsel %vm101_vm2, %v2414_v7, %v966_v12  ;;  %v2406_v24 = vld [vmem:[%s5016_s0 + $0xc6] sm:$0x8]   ;;  %v932_v29 = vsel %vm97_vm1, %v2405_v18, %v928_v23 }
  0x3f   :  { %779 = vrot.lane.b32.xlu1 %v778_v28, %s2737_s6  ;;  %v2347_v0 = vld [vmem:[%s5016_s0 + $0x195] sm:$0x40]   ;;  %v2416_v13 = vld [vmem:[%s5016_s0 + $0x154] sm:$0x20]   ;;  %v700_v14 = vsel %vm109_vm4, %v2346_v61, %v696_v10  ;;  %v974_v21 = vsel %vm105_vm3, %v2415_v8, %v970_v15  ;;  %v2407_v25 = vld [vmem:[%s5016_s0 + $0x105] sm:$0x10]   ;;  %v936_v33 = vsel %vm101_vm2, %v2406_v24, %v932_v29 }
  0x40   :  { %v2348_v11 = vld [vmem:[%s5016_s0 + $0x1d4] sm:$0x80]   ;;  %v704_v20 = vsel %vm113_vm5, %v2347_v0, %v700_v14  ;;  %v2417_v22 = vld [vmem:[%s5016_s0 + $0x193] sm:$0x40]   ;;  %s2738_s20 = smov 80   ;;  %v978_v27 = vsel %vm109_vm4, %v2416_v13, %v974_v21  ;;  %s2739_s12 = smov 72  }
  0x41   :  { %v708_v26 = vsel %vm117_vm6, %v2348_v11, %v704_v20  ;;  %v2418_v28 = vld [vmem:[%s5016_s0 + $0x1d2] sm:$0x80]   ;;  %v2408_v30 = vld [vmem:[%s5016_s0 + $0x144] sm:$0x20]   ;;  %v2368_v32 = vld [vmem:[%s5016_s0 + $0xa] sm:$0x1]   ;;  %v982_v37 = vsel %vm113_vm5, %v2417_v22, %v978_v27 }
  0x42   :  { %744 = vrot.lane.b32.xlu0 %v743_v38, %s2737_s6  ;;  %v2409_v31 = vld [vmem:[%s5016_s0 + $0x183] sm:$0x40]   ;;  %v2369_v34 = vld [vmem:[%s5016_s0 + $0x49] sm:$0x2]   ;;  %v940_v38 = vsel %vm105_vm3, %v2407_v25, %v936_v33  ;;  %v2438_v46 = vld [vmem:[%s5016_s0 + $0x8] sm:$0x1]   ;;  %v986_v54 = vsel %vm117_vm6, %v2418_v28, %v982_v37 }
  0x43   :  { %709 = vrot.lane.b32.xlu2 %v708_v26, %s2737_s6  ;;  %v2370_v35 = vld [vmem:[%s5016_s0 + $0x88] sm:$0x4]   ;;  %v2410_v39 = vld [vmem:[%s5016_s0 + $0x1c2] sm:$0x80]   ;;  %v789_v40 = vsel %vm93_vm0, %v2369_v34, %v2368_v32  ;;  %v944_v43 = vsel %vm109_vm4, %v2408_v30, %v940_v38  ;;  %v2439_v47 = vld [vmem:[%s5016_s0 + $0x47] sm:$0x2]  }
  0x44   :  { %v2371_v36 = vld [vmem:[%s5016_s0 + $0xc7] sm:$0x8]   ;;  %v793_v44 = vsel %vm97_vm1, %v2370_v35, %v789_v40  ;;  %v948_v48 = vsel %vm113_vm5, %v2409_v31, %v944_v43  ;;  %v1067_v50 = vsel %vm93_vm0, %v2439_v47, %v2438_v46  ;;  %v2440_v51 = vld [vmem:[%s5016_s0 + $0x86] sm:$0x4]   ;;  %v2429_v61 = vld [vmem:[%s5016_s0 + $0x39] sm:$0x1]  }
  0x45   :  { %v2372_v41 = vld [vmem:[%s5016_s0 + $0x106] sm:$0x10]   ;;  %v797_v49 = vsel %vm101_vm2, %v2371_v36, %v793_v44  ;;  %v2441_v52 = vld [vmem:[%s5016_s0 + $0xc5] sm:$0x8]   ;;  %v1071_v57 = vsel %vm97_vm1, %v2440_v51, %v1067_v50  ;;  %v2430_v62 = vld [vmem:[%s5016_s0 + $0x78] sm:$0x2]   ;;  %v952_v0 = vsel %vm117_vm6, %v2410_v39, %v948_v48 }
  0x46   :  { %v2373_v42 = vld [vmem:[%s5016_s0 + $0x145] sm:$0x20]   ;;  %v2442_v53 = vld [vmem:[%s5016_s0 + $0x104] sm:$0x10]   ;;  %v801_v55 = vsel %vm105_vm3, %v2372_v41, %v797_v49  ;;  %v1075_v60 = vsel %vm101_vm2, %v2441_v52, %v1071_v57  ;;  %v2431_v63 = vld [vmem:[%s5016_s0 + $0xb7] sm:$0x4]   ;;  %v1032_v4 = vsel %vm93_vm0, %v2430_v62, %v2429_v61 }
  0x47   :  { %883 = vrot.lane.b32.xlu1 %v882_v9, %s2738_s20  ;;  %v2374_v45 = vld [vmem:[%s5016_s0 + $0x184] sm:$0x40]   ;;  %v2443_v58 = vld [vmem:[%s5016_s0 + $0x143] sm:$0x20]   ;;  %v805_v59 = vsel %vm109_vm4, %v2373_v42, %v801_v55  ;;  %v1079_v2 = vsel %vm105_vm3, %v2442_v53, %v1075_v60  ;;  %v2432_v5 = vld [vmem:[%s5016_s0 + $0xf6] sm:$0x8]   ;;  %v1036_v10 = vsel %vm97_vm1, %v2431_v63, %v1032_v4 }
  0x48   :  { %v2375_v56 = vld [vmem:[%s5016_s0 + $0x1c3] sm:$0x80]   ;;  %v809_v1 = vsel %vm113_vm5, %v2374_v45, %v805_v59  ;;  %v2444_v3 = vld [vmem:[%s5016_s0 + $0x182] sm:$0x40]   ;;  %v2433_v6 = vld [vmem:[%s5016_s0 + $0x135] sm:$0x10]   ;;  %v1083_v8 = vsel %vm109_vm4, %v2443_v58, %v1079_v2  ;;  %v1040_v14 = vsel %vm101_vm2, %v2432_v5, %v1036_v10 }
  0x49   :  { %v813_v7 = vsel %vm117_vm6, %v2375_v56, %v809_v1  ;;  %v2445_v9 = vld [vmem:[%s5016_s0 + $0x1c1] sm:$0x80]   ;;  %v2434_v11 = vld [vmem:[%s5016_s0 + $0x174] sm:$0x20]   ;;  %v2394_v13 = vld [vmem:[%s5016_s0 + $0x3a] sm:$0x1]   ;;  %v1087_v18 = vsel %vm113_vm5, %v2444_v3, %v1083_v8 }
  0x4a   :  { %848 = vrot.lane.b32.xlu0 %v847_v19, %s2738_s20  ;;  %v2435_v12 = vld [vmem:[%s5016_s0 + $0x1b3] sm:$0x40]   ;;  %v2395_v15 = vld [vmem:[%s5016_s0 + $0x79] sm:$0x2]   ;;  %v1044_v19 = vsel %vm105_vm3, %v2433_v6, %v1040_v14  ;;  %v2464_v27 = vld [vmem:[%s5016_s0 + $0x38] sm:$0x1]   ;;  %v1091_v35 = vsel %vm117_vm6, %v2445_v9, %v1087_v18 }
  0x4b   :  { %814 = vrot.lane.b32.xlu2 %v813_v7, %s2738_s20  ;;  %v2396_v16 = vld [vmem:[%s5016_s0 + $0xb8] sm:$0x4]   ;;  %v2436_v20 = vld [vmem:[%s5016_s0 + $0x1f2] sm:$0x80]   ;;  %v893_v21 = vsel %vm93_vm0, %v2395_v15, %v2394_v13  ;;  %v1048_v24 = vsel %vm109_vm4, %v2434_v11, %v1044_v19  ;;  %v2465_v28 = vld [vmem:[%s5016_s0 + $0x77] sm:$0x2]  }
  0x4c   :  { %v2397_v17 = vld [vmem:[%s5016_s0 + $0xf7] sm:$0x8]   ;;  %v897_v25 = vsel %vm97_vm1, %v2396_v16, %v893_v21  ;;  %v1052_v29 = vsel %vm113_vm5, %v2435_v12, %v1048_v24  ;;  %v1171_v31 = vsel %vm93_vm0, %v2465_v28, %v2464_v27  ;;  %v2466_v32 = vld [vmem:[%s5016_s0 + $0xb6] sm:$0x4]   ;;  %v2455_v42 = vld [vmem:[%s5016_s0 + $0x28] sm:$0x1]  }
  0x4d   :  { %v2398_v22 = vld [vmem:[%s5016_s0 + $0x136] sm:$0x10]   ;;  %v901_v30 = vsel %vm101_vm2, %v2397_v17, %v897_v25  ;;  %v2467_v33 = vld [vmem:[%s5016_s0 + $0xf5] sm:$0x8]   ;;  %v1175_v38 = vsel %vm97_vm1, %v2466_v32, %v1171_v31  ;;  %v2456_v43 = vld [vmem:[%s5016_s0 + $0x67] sm:$0x2]   ;;  %v1056_v45 = vsel %vm117_vm6, %v2436_v20, %v1052_v29 }
  0x4e   :  { %v2399_v23 = vld [vmem:[%s5016_s0 + $0x175] sm:$0x20]   ;;  %v2468_v34 = vld [vmem:[%s5016_s0 + $0x134] sm:$0x10]   ;;  %v905_v36 = vsel %vm105_vm3, %v2398_v22, %v901_v30  ;;  %v1179_v41 = vsel %vm101_vm2, %v2467_v33, %v1175_v38  ;;  %v2457_v44 = vld [vmem:[%s5016_s0 + $0xa6] sm:$0x4]   ;;  %v1136_v49 = vsel %vm93_vm0, %v2456_v43, %v2455_v42 }
  0x4f   :  { %987 = vrot.lane.b32.xlu1 %v986_v54, %s2739_s12  ;;  %v2400_v26 = vld [vmem:[%s5016_s0 + $0x1b4] sm:$0x40]   ;;  %v2469_v39 = vld [vmem:[%s5016_s0 + $0x173] sm:$0x20]   ;;  %v909_v40 = vsel %vm109_vm4, %v2399_v23, %v905_v36  ;;  %v1183_v47 = vsel %vm105_vm3, %v2468_v34, %v1179_v41  ;;  %v2458_v50 = vld [vmem:[%s5016_s0 + $0xe5] sm:$0x8]   ;;  %v1140_v55 = vsel %vm97_vm1, %v2457_v44, %v1136_v49 }
  0x50   :  { %v2401_v37 = vld [vmem:[%s5016_s0 + $0x1f3] sm:$0x80]   ;;  %v913_v46 = vsel %vm113_vm5, %v2400_v26, %v909_v40  ;;  %v2470_v48 = vld [vmem:[%s5016_s0 + $0x1b2] sm:$0x40]   ;;  %v2459_v51 = vld [vmem:[%s5016_s0 + $0x124] sm:$0x10]   ;;  %v1187_v53 = vsel %vm109_vm4, %v2469_v39, %v1183_v47  ;;  %v1144_v59 = vsel %vm101_vm2, %v2458_v50, %v1140_v55 }
  0x51   :  { %s2740_s7 = smov 64   ;;  %v917_v52 = vsel %vm117_vm6, %v2401_v37, %v913_v46  ;;  %v2471_v54 = vld [vmem:[%s5016_s0 + $0x1f1] sm:$0x80]   ;;  %v2460_v56 = vld [vmem:[%s5016_s0 + $0x163] sm:$0x20]   ;;  %v1191_v63 = vsel %vm113_vm5, %v2470_v48, %v1187_v53  ;;  %s2741_s21 = smov 56  }
  0x52   :  { %953 = vrot.lane.b32.xlu0 %v952_v0, %s2739_s12  ;;  %v2461_v57 = vld [vmem:[%s5016_s0 + $0x1a2] sm:$0x40]   ;;  %v2420_v58 = vld [vmem:[%s5016_s0 + $0x29] sm:$0x1]   ;;  %v1148_v0 = vsel %vm105_vm3, %v2459_v51, %v1144_v59  ;;  %v2490_v8 = vld [vmem:[%s5016_s0 + $0x27] sm:$0x1]   ;;  %v1195_v16 = vsel %vm117_vm6, %v2471_v54, %v1191_v63 }
  0x53   :  { %918 = vrot.lane.b32.xlu2 %v917_v52, %s2738_s20  ;;  %v2421_v60 = vld [vmem:[%s5016_s0 + $0x68] sm:$0x2]   ;;  %v2462_v1 = vld [vmem:[%s5016_s0 + $0x1e1] sm:$0x80]   ;;  %v1152_v5 = vsel %vm109_vm4, %v2460_v56, %v1148_v0  ;;  %v2491_v9 = vld [vmem:[%s5016_s0 + $0x66] sm:$0x2]  }
  0x54   :  { %v2422_v61 = vld [vmem:[%s5016_s0 + $0xa7] sm:$0x4]   ;;  %v997_v2 = vsel %vm93_vm0, %v2421_v60, %v2420_v58  ;;  %v1156_v10 = vsel %vm113_vm5, %v2461_v57, %v1152_v5  ;;  %v1275_v12 = vsel %vm93_vm0, %v2491_v9, %v2490_v8  ;;  %v2492_v13 = vld [vmem:[%s5016_s0 + $0xa5] sm:$0x4]   ;;  %v2481_v23 = vld [vmem:[%s5016_s0 + $0x17] sm:$0x1]  }
  0x55   :  { %v2423_v62 = vld [vmem:[%s5016_s0 + $0xe6] sm:$0x8]   ;;  %v1001_v6 = vsel %vm97_vm1, %v2422_v61, %v997_v2  ;;  %v2493_v14 = vld [vmem:[%s5016_s0 + $0xe4] sm:$0x8]   ;;  %v1279_v19 = vsel %vm97_vm1, %v2492_v13, %v1275_v12  ;;  %v2482_v24 = vld [vmem:[%s5016_s0 + $0x56] sm:$0x2]   ;;  %v1160_v26 = vsel %vm117_vm6, %v2462_v1, %v1156_v10 }
  0x56   :  { %v2424_v3 = vld [vmem:[%s5016_s0 + $0x125] sm:$0x10]   ;;  %v1005_v11 = vsel %vm101_vm2, %v2423_v62, %v1001_v6  ;;  %v2494_v15 = vld [vmem:[%s5016_s0 + $0x123] sm:$0x10]   ;;  %v1283_v22 = vsel %vm101_vm2, %v2493_v14, %v1279_v19  ;;  %v2483_v25 = vld [vmem:[%s5016_s0 + $0x95] sm:$0x4]   ;;  %v1240_v30 = vsel %vm93_vm0, %v2482_v24, %v2481_v23 }
  0x57   :  { %1092 = vrot.lane.b32.xlu1 %v1091_v35, %s2740_s7  ;;  %v2425_v4 = vld [vmem:[%s5016_s0 + $0x164] sm:$0x20]   ;;  %v1009_v17 = vsel %vm105_vm3, %v2424_v3, %v1005_v11  ;;  %v2495_v20 = vld [vmem:[%s5016_s0 + $0x162] sm:$0x20]   ;;  %v1287_v28 = vsel %vm105_vm3, %v2494_v15, %v1283_v22  ;;  %v2484_v31 = vld [vmem:[%s5016_s0 + $0xd4] sm:$0x8]   ;;  %v1244_v36 = vsel %vm97_vm1, %v2483_v25, %v1240_v30 }
  0x58   :  { %v2426_v7 = vld [vmem:[%s5016_s0 + $0x1a3] sm:$0x40]   ;;  %v1013_v21 = vsel %vm109_vm4, %v2425_v4, %v1009_v17  ;;  %v2496_v29 = vld [vmem:[%s5016_s0 + $0x1a1] sm:$0x40]   ;;  %v2485_v32 = vld [vmem:[%s5016_s0 + $0x113] sm:$0x10]   ;;  %v1291_v34 = vsel %vm109_vm4, %v2495_v20, %v1287_v28  ;;  %v1248_v40 = vsel %vm101_vm2, %v2484_v31, %v1244_v36 }
  0x59   :  { %v2427_v18 = vld [vmem:[%s5016_s0 + $0x1e2] sm:$0x80]   ;;  %v1017_v27 = vsel %vm113_vm5, %v2426_v7, %v1013_v21  ;;  %v2497_v35 = vld [vmem:[%s5016_s0 + $0x1e0] sm:$0x80]   ;;  %v2486_v37 = vld [vmem:[%s5016_s0 + $0x152] sm:$0x20]   ;;  %v1295_v44 = vsel %vm113_vm5, %v2496_v29, %v1291_v34 }
  0x5a   :  { %1057 = vrot.lane.b32.xlu0 %v1056_v45, %s2739_s12  ;;  %v1021_v33 = vsel %vm117_vm6, %v2427_v18, %v1017_v27  ;;  %v2487_v38 = vld [vmem:[%s5016_s0 + $0x191] sm:$0x40]   ;;  %v2446_v39 = vld [vmem:[%s5016_s0 + $0x18] sm:$0x1]   ;;  %v1252_v45 = vsel %vm105_vm3, %v2485_v32, %v1248_v40  ;;  %v2516_v54 = vld [vmem:[%s5016_s0 + $0x16] sm:$0x1]   ;;  %v1299_v60 = vsel %vm117_vm6, %v2497_v35, %v1295_v44 }
  0x5b   :  { %1022 = vrot.lane.b32.xlu2 %v1021_v33, %s2739_s12  ;;  %v2447_v41 = vld [vmem:[%s5016_s0 + $0x57] sm:$0x2]   ;;  %v2488_v46 = vld [vmem:[%s5016_s0 + $0x1d0] sm:$0x80]   ;;  %v1256_v50 = vsel %vm109_vm4, %v2486_v37, %v1252_v45  ;;  %v2517_v57 = vld [vmem:[%s5016_s0 + $0x55] sm:$0x2]  }
  0x5c   :  { %v2448_v42 = vld [vmem:[%s5016_s0 + $0x96] sm:$0x4]   ;;  %v1101_v47 = vsel %vm93_vm0, %v2447_v41, %v2446_v39  ;;  %v1260_v55 = vsel %vm113_vm5, %v2487_v38, %v1256_v50  ;;  %v2518_v58 = vld [vmem:[%s5016_s0 + $0x94] sm:$0x4]   ;;  %v1379_v62 = vsel %vm93_vm0, %v2517_v57, %v2516_v54  ;;  %v2508_v4 = vld [vmem:[%s5016_s0 + $0x6] sm:$0x1]  }
  0x5d   :  { %v2449_v43 = vld [vmem:[%s5016_s0 + $0xd5] sm:$0x8]   ;;  %v1105_v51 = vsel %vm97_vm1, %v2448_v42, %v1101_v47  ;;  %v2519_v59 = vld [vmem:[%s5016_s0 + $0xd3] sm:$0x8]   ;;  %v1383_v2 = vsel %vm97_vm1, %v2518_v58, %v1379_v62  ;;  %v2509_v5 = vld [vmem:[%s5016_s0 + $0x45] sm:$0x2]   ;;  %v1264_v6 = vsel %vm117_vm6, %v2488_v46, %v1260_v55 }
  0x5e   :  { %v2450_v48 = vld [vmem:[%s5016_s0 + $0x114] sm:$0x10]   ;;  %v1109_v56 = vsel %vm101_vm2, %v2449_v43, %v1105_v51  ;;  %v2520_v63 = vld [vmem:[%s5016_s0 + $0x112] sm:$0x10]   ;;  %v1387_v8 = vsel %vm101_vm2, %v2519_v59, %v1383_v2  ;;  %v1345_v9 = vsel %vm93_vm0, %v2509_v5, %v2508_v4  ;;  %v2510_v10 = vld [vmem:[%s5016_s0 + $0x84] sm:$0x4]  }
  0x5f   :  { %1196 = vrot.lane.b32.xlu1 %v1195_v16, %s2740_s7  ;;  %v2451_v49 = vld [vmem:[%s5016_s0 + $0x153] sm:$0x20]   ;;  %v1113_v61 = vsel %vm105_vm3, %v2450_v48, %v1109_v56  ;;  %v2521_v0 = vld [vmem:[%s5016_s0 + $0x151] sm:$0x20]   ;;  %v2511_v11 = vld [vmem:[%s5016_s0 + $0xc3] sm:$0x8]   ;;  %v1391_v14 = vsel %vm105_vm3, %v2520_v63, %v1387_v8  ;;  %v1349_v16 = vsel %vm97_vm1, %v2510_v10, %v1345_v9 }
  0x60   :  { %v2452_v52 = vld [vmem:[%s5016_s0 + $0x192] sm:$0x40]   ;;  %v1117_v1 = vsel %vm109_vm4, %v2451_v49, %v1113_v61  ;;  %v2522_v3 = vld [vmem:[%s5016_s0 + $0x190] sm:$0x40]   ;;  %v2512_v12 = vld [vmem:[%s5016_s0 + $0x102] sm:$0x10]   ;;  %v1395_v19 = vsel %vm109_vm4, %v2521_v0, %v1391_v14  ;;  %v1353_v20 = vsel %vm101_vm2, %v2511_v11, %v1349_v16 }
  0x61   :  { %v2453_v53 = vld [vmem:[%s5016_s0 + $0x1d1] sm:$0x80]   ;;  %v1121_v7 = vsel %vm113_vm5, %v2452_v52, %v1117_v1  ;;  %v2523_v15 = vld [vmem:[%s5016_s0 + $0x1cf] sm:$0x80]   ;;  %v2513_v17 = vld [vmem:[%s5016_s0 + $0x141] sm:$0x20]   ;;  %v1399_v24 = vsel %vm113_vm5, %v2522_v3, %v1395_v19  ;;  %v1357_v25 = vsel %vm105_vm3, %v2512_v12, %v1353_v20 }
  0x62   :  { %1161 = vrot.lane.b32.xlu0 %v1160_v26, %s2740_s7  ;;  %v1125_v13 = vsel %vm117_vm6, %v2453_v53, %v1121_v7  ;;  %v2514_v18 = vld [vmem:[%s5016_s0 + $0x180] sm:$0x40]   ;;  %v2473_v21 = vld [vmem:[%s5016_s0 + $0x7] sm:$0x1]   ;;  %v1361_v30 = vsel %vm109_vm4, %v2513_v17, %v1357_v25  ;;  %v2543_v34 = vld [vmem:[%s5016_s0 + $0x5] sm:$0x1]   ;;  %v1403_v40 = vsel %vm117_vm6, %v2523_v15, %v1399_v24 }
  0x63   :  { %1126 = vrot.lane.b32.xlu2 %v1125_v13, %s2740_s7  ;;  %v2474_v22 = vld [vmem:[%s5016_s0 + $0x46] sm:$0x2]   ;;  %v2515_v26 = vld [vmem:[%s5016_s0 + $0x1bf] sm:$0x80]   ;;  %v1365_v35 = vsel %vm113_vm5, %v2514_v18, %v1361_v30  ;;  %v2544_v37 = vld [vmem:[%s5016_s0 + $0x44] sm:$0x2]  }
  0x64   :  { %v2475_v23 = vld [vmem:[%s5016_s0 + $0x85] sm:$0x4]   ;;  %v1206_v27 = vsel %vm93_vm0, %v2474_v22, %v2473_v21  ;;  %v2545_v38 = vld [vmem:[%s5016_s0 + $0x83] sm:$0x4]   ;;  %v1484_v43 = vsel %vm93_vm0, %v2544_v37, %v2543_v34  ;;  %v2534_v49 = vld [vmem:[%s5016_s0 + $0x36] sm:$0x1]   ;;  %v1369_v51 = vsel %vm117_vm6, %v2515_v26, %v1365_v35 }
  0x65   :  { %v2476_v28 = vld [vmem:[%s5016_s0 + $0xc4] sm:$0x8]   ;;  %v1210_v31 = vsel %vm97_vm1, %v2475_v23, %v1206_v27  ;;  %v2546_v39 = vld [vmem:[%s5016_s0 + $0xc2] sm:$0x8]   ;;  %v1488_v47 = vsel %vm97_vm1, %v2545_v38, %v1484_v43  ;;  %v2535_v50 = vld [vmem:[%s5016_s0 + $0x75] sm:$0x2]  }
  0x66   :  { %v2477_v29 = vld [vmem:[%s5016_s0 + $0x103] sm:$0x10]   ;;  %v1214_v36 = vsel %vm101_vm2, %v2476_v28, %v1210_v31  ;;  %v2547_v44 = vld [vmem:[%s5016_s0 + $0x101] sm:$0x10]   ;;  %v1492_v53 = vsel %vm101_vm2, %v2546_v39, %v1488_v47  ;;  %v1449_v54 = vsel %vm93_vm0, %v2535_v50, %v2534_v49  ;;  %v2536_v55 = vld [vmem:[%s5016_s0 + $0xb4] sm:$0x4]  }
  0x67   :  { %1300 = vrot.lane.b32.xlu1 %v1299_v60, %s2741_s21  ;;  %v2478_v32 = vld [vmem:[%s5016_s0 + $0x142] sm:$0x20]   ;;  %v1218_v41 = vsel %vm105_vm3, %v2477_v29, %v1214_v36  ;;  %v2548_v45 = vld [vmem:[%s5016_s0 + $0x140] sm:$0x20]   ;;  %v2537_v56 = vld [vmem:[%s5016_s0 + $0xf3] sm:$0x8]   ;;  %v1496_v59 = vsel %vm105_vm3, %v2547_v44, %v1492_v53  ;;  %v1453_v61 = vsel %vm97_vm1, %v2536_v55, %v1449_v54 }
  0x68   :  { %v2479_v33 = vld [vmem:[%s5016_s0 + $0x181] sm:$0x40]   ;;  %v1222_v46 = vsel %vm109_vm4, %v2478_v32, %v1218_v41  ;;  %v2549_v48 = vld [vmem:[%s5016_s0 + $0x17f] sm:$0x40]   ;;  %v2538_v57 = vld [vmem:[%s5016_s0 + $0x132] sm:$0x10]   ;;  %v1500_v0 = vsel %vm109_vm4, %v2548_v45, %v1496_v59  ;;  %v1457_v1 = vsel %vm101_vm2, %v2537_v56, %v1453_v61 }
  0x69   :  { %v2480_v42 = vld [vmem:[%s5016_s0 + $0x1c0] sm:$0x80]   ;;  %v1226_v52 = vsel %vm113_vm5, %v2479_v33, %v1222_v46  ;;  %s2742_s13 = smov 48   ;;  %v2550_v60 = vld [vmem:[%s5016_s0 + $0x1be] sm:$0x80]   ;;  %v1504_v5 = vsel %vm113_vm5, %v2549_v48, %v1500_v0  ;;  %s2743_s8 = smov 40  }
  0x6a   :  { %1265 = vrot.lane.b32.xlu0 %v1264_v6, %s2741_s21  ;;  %v1230_v58 = vsel %vm117_vm6, %v2480_v42, %v1226_v52  ;;  %v2539_v62 = vld [vmem:[%s5016_s0 + $0x171] sm:$0x20]   ;;  %v2499_v2 = vld [vmem:[%s5016_s0 + $0x37] sm:$0x1]   ;;  %v1461_v6 = vsel %vm105_vm3, %v2538_v57, %v1457_v1  ;;  %v2569_v15 = vld [vmem:[%s5016_s0 + $0x35] sm:$0x1]   ;;  %v1508_v21 = vsel %vm117_vm6, %v2550_v60, %v1504_v5 }
  0x6b   :  { %v2540_v63 = vld [vmem:[%s5016_s0 + $0x1b0] sm:$0x40]   ;;  %1231 = vrot.lane.b32.xlu2 %v1230_v58, %s2741_s21  ;;  %v2500_v3 = vld [vmem:[%s5016_s0 + $0x76] sm:$0x2]   ;;  %v1465_v11 = vsel %vm109_vm4, %v2539_v62, %v1461_v6  ;;  %v2570_v18 = vld [vmem:[%s5016_s0 + $0x74] sm:$0x2]  }
  0x6c   :  { %v2501_v4 = vld [vmem:[%s5016_s0 + $0xb5] sm:$0x4]   ;;  %v2541_v7 = vld [vmem:[%s5016_s0 + $0x1ef] sm:$0x80]   ;;  %v1310_v8 = vsel %vm93_vm0, %v2500_v3, %v2499_v2  ;;  %v1469_v16 = vsel %vm113_vm5, %v2540_v63, %v1465_v11  ;;  %v2571_v19 = vld [vmem:[%s5016_s0 + $0xb3] sm:$0x4]   ;;  %v1588_v24 = vsel %vm93_vm0, %v2570_v18, %v2569_v15 }
  0x6d   :  { %v2502_v9 = vld [vmem:[%s5016_s0 + $0xf4] sm:$0x8]   ;;  %v1314_v12 = vsel %vm97_vm1, %v2501_v4, %v1310_v8  ;;  %v2572_v20 = vld [vmem:[%s5016_s0 + $0xf2] sm:$0x8]   ;;  %v1592_v28 = vsel %vm97_vm1, %v2571_v19, %v1588_v24  ;;  %v2560_v30 = vld [vmem:[%s5016_s0 + $0x25] sm:$0x1]   ;;  %v1473_v32 = vsel %vm117_vm6, %v2541_v7, %v1469_v16 }
  0x6e   :  { %v2503_v10 = vld [vmem:[%s5016_s0 + $0x133] sm:$0x10]   ;;  %v1318_v17 = vsel %vm101_vm2, %v2502_v9, %v1314_v12  ;;  %v2573_v25 = vld [vmem:[%s5016_s0 + $0x131] sm:$0x10]   ;;  %v2561_v31 = vld [vmem:[%s5016_s0 + $0x64] sm:$0x2]   ;;  %v1596_v34 = vsel %vm101_vm2, %v2572_v20, %v1592_v28 }
  0x6f   :  { %1404 = vrot.lane.b32.xlu1 %v1403_v40, %s2742_s13  ;;  %v2504_v13 = vld [vmem:[%s5016_s0 + $0x172] sm:$0x20]   ;;  %v1322_v22 = vsel %vm105_vm3, %v2503_v10, %v1318_v17  ;;  %v2574_v26 = vld [vmem:[%s5016_s0 + $0x170] sm:$0x20]   ;;  %v1553_v35 = vsel %vm93_vm0, %v2561_v31, %v2560_v30  ;;  %v2562_v36 = vld [vmem:[%s5016_s0 + $0xa3] sm:$0x4]   ;;  %v1600_v40 = vsel %vm105_vm3, %v2573_v25, %v1596_v34 }
  0x70   :  { %v2505_v14 = vld [vmem:[%s5016_s0 + $0x1b1] sm:$0x40]   ;;  %v1326_v27 = vsel %vm109_vm4, %v2504_v13, %v1322_v22  ;;  %v2575_v29 = vld [vmem:[%s5016_s0 + $0x1af] sm:$0x40]   ;;  %v2563_v37 = vld [vmem:[%s5016_s0 + $0xe2] sm:$0x8]   ;;  %v1557_v42 = vsel %vm97_vm1, %v2562_v36, %v1553_v35  ;;  %v1604_v44 = vsel %vm109_vm4, %v2574_v26, %v1600_v40 }
  0x71   :  { %v2506_v23 = vld [vmem:[%s5016_s0 + $0x1f0] sm:$0x80]   ;;  %v1330_v33 = vsel %vm113_vm5, %v2505_v14, %v1326_v27  ;;  %v2564_v38 = vld [vmem:[%s5016_s0 + $0x121] sm:$0x10]   ;;  %v2576_v41 = vld [vmem:[%s5016_s0 + $0x1ee] sm:$0x80]   ;;  %v1561_v45 = vsel %vm101_vm2, %v2563_v37, %v1557_v42  ;;  %v1608_v47 = vsel %vm113_vm5, %v2575_v29, %v1604_v44 }
  0x72   :  { %1370 = vrot.lane.b32.xlu0 %v1369_v51, %s2742_s13  ;;  %v1334_v39 = vsel %vm117_vm6, %v2506_v23, %v1330_v33  ;;  %v2565_v43 = vld [vmem:[%s5016_s0 + $0x160] sm:$0x20]   ;;  %s2_s15 = smov 3  ;;  %s4_s24 = smov 12  ;;  %vm6_vm7 = vcmask 1043458   ;;  %v1565_v48 = vsel %vm105_vm3, %v2564_v38, %v1561_v45  ;;  %vm10_vm8 = vcmask 1045508  }
  0x73   :  { %1335 = vrot.lane.b32.xlu2 %v1334_v39, %s2741_s21  ;;  %v2566_v46 = vld [vmem:[%s5016_s0 + $0x19f] sm:$0x40]   ;;  %s8_s17 = smov 48  ;;  %s12_s18 = smov 192  ;;  %v3_v51 = vld [vmem:[%s5016_s0] ss:$16 sm:%s2_s15]   ;;  %v1569_v52 = vsel %vm109_vm4, %v2565_v43, %v1565_v48  ;;  %v1612_v58 = vsel %vm117_vm6, %v2576_v41, %v1608_v47 }
  0x74   :  { %v2567_v49 = vld [vmem:[%s5016_s0 + $0x1de] sm:$0x80]   ;;  %vm14_vm9 = vcmask 1047558   ;;  %vm16_vm10 = vcmask 64512   ;;  %s21_s23 = smov 3  ;;  %s24_s3 = smov 12  ;;  %v1573_v54 = vsel %vm113_vm5, %v2566_v46, %v1569_v52 }
  0x75   :  { %v4096_v50 = vpop.permute.xlu2 %258   ;;  %v5_v53 = vld [vmem:[%s5016_s0] ss:$16 sm:%s4_s24]   ;;  %s29_s25 = smov 48  ;;  %s34_s7 = smov 192  ;;  %v1577_v2 = vsel %vm117_vm6, %v2567_v49, %v1573_v54  ;;  %v2525_v8 = vld [vmem:[%s5016_s0 + $0x26] sm:$0x1]  }
  0x76   :  { %v7_v55 = vsel %vm6_vm7, %v5_v53, %v3_v51  ;;  %v9_v56 = vld [vmem:[%s5016_s0] ss:$16 sm:%s8_s17]   ;;  %s44_s12 = smov 3  ;;  %s47_s9 = smov 12  ;;  %v2526_v22 = vld [vmem:[%s5016_s0 + $0x65] sm:$0x2]  }
  0x77   :  { %1509 = vrot.lane.b32.xlu1 %v1508_v21, %s2743_s8  ;;  %v13_v57 = vld [vmem:[%s5016_s0] ss:$16 sm:%s12_s18]   ;;  %v11_v59 = vsel %vm10_vm8, %v9_v56, %v7_v55  ;;  %s52_s24 = smov 48  ;;  %s57_s20 = smov 192  ;;  %vm121_vm11 = vcmask 1048512   ;;  %v1414_v24 = vsel %vm93_vm0, %v2526_v22, %v2525_v8  ;;  %vm260_vm12 = vcmask 982912  }
  0x78   :  { %v2175_v60 = vld [vmem:[%s5016_s0 + $0x80] ss:$16 sm:%s21_s23]   ;;  %v15_v62 = vsel %vm14_vm9, %v13_v57, %v11_v59  ;;  %s67_s18 = smov 3  ;;  %s70_s19 = smov 12  ;;  %v2527_v25 = vld [vmem:[%s5016_s0 + $0xa4] sm:$0x4]  }
  0x79   :  { %v2176_v61 = vld [vmem:[%s5016_s0 + $0x80] ss:$16 sm:%s24_s3]   ;;  %17 = vst.msk [vmem:[%s5017_s1] ss:$8 sm:$0xf] %vm16_vm10, %v15_v62   ;;  %s75_s3 = smov 48  ;;  %v1418_v26 = vsel %vm97_vm1, %v2527_v25, %v1414_v24 }
  0x7a   :  { %1474 = vrot.lane.b32.xlu0 %v1473_v32, %s2742_s13  ;;  %v27_v63 = vsel %vm6_vm7, %v2176_v61, %v2175_v60  ;;  %v2177_v0 = vld [vmem:[%s5016_s0 + $0x80] ss:$16 sm:%s29_s25]   ;;  %2174 = vst.msk [vmem:[%s5017_s1 - $0x1f] ss:$8 sm:$0xf0] %vm16_vm10, %v15_v62   ;;  %s80_s28 = smov 192 }
  0x7b   :  { %v2178_v1 = vld [vmem:[%s5016_s0 + $0x80] ss:$16 sm:%s34_s7]   ;;  %v32_v3 = vsel %vm10_vm8, %v2177_v0, %v27_v63  ;;  %v2528_v27 = vld [vmem:[%s5016_s0 + $0xe3] sm:$0x8]   ;;  %v2595_v37 = vld [vmem:[%s5016_s0 + $0x24] sm:$0x1]  }
  0x7c   :  { %v37_v4 = vsel %vm14_vm9, %v2178_v1, %v32_v3  ;;  %v2181_v5 = vld [vmem:[%s5016_s0 + $0x100] ss:$16 sm:%s44_s12]   ;;  %v1422_v28 = vsel %vm101_vm2, %v2528_v27, %v1418_v26  ;;  %v2529_v29 = vld [vmem:[%s5016_s0 + $0x122] sm:$0x10]   ;;  %v2596_v39 = vld [vmem:[%s5016_s0 + $0x63] sm:$0x2]  }
  0x7d   :  { %2179 = vst.msk [vmem:[%s5017_s1 + $0x2] ss:$8 sm:$0xf] %vm16_vm10, %v37_v4   ;;  %v2182_v6 = vld [vmem:[%s5016_s0 + $0x100] ss:$16 sm:%s47_s9]   ;;  %v4159_v9 = vpop.permute.xlu2 %292   ;;  %v1426_v30 = vsel %vm105_vm3, %v2529_v29, %v1422_v28  ;;  %v1692_v43 = vsel %vm93_vm0, %v2596_v39, %v2595_v37  ;;  %s2744_s11 = smov 32  }
  0x7e   :  { %2180 = vst.msk [vmem:[%s5017_s1 - $0x1d] ss:$8 sm:$0xf0] %vm16_vm10, %v37_v4   ;;  %v50_v10 = vsel %vm6_vm7, %v2182_v6, %v2181_v5  ;;  %v2183_v11 = vld [vmem:[%s5016_s0 + $0x100] ss:$16 sm:%s52_s24]   ;;  %vm399_vm13 = vcmask 917312  }
  0x7f   :  { %1613 = vrot.lane.b32.xlu1 %v1612_v58, %s2743_s8  ;;  %v2184_v12 = vld [vmem:[%s5016_s0 + $0x100] ss:$16 sm:%s57_s20]   ;;  %v55_v13 = vsel %vm10_vm8, %v2183_v11, %v50_v10  ;;  %v2530_v31 = vld [vmem:[%s5016_s0 + $0x161] sm:$0x20]   ;;  %s2745_s21 = smov 24   ;;  %vm538_vm14 = vcmask 851712  }
  0x80   :  { %v2187_v14 = vld [vmem:[%s5016_s0 + $0x180] ss:$16 sm:%s67_s18]   ;;  %v60_v17 = vsel %vm14_vm9, %v2184_v12, %v55_v13  ;;  %v2531_v32 = vld [vmem:[%s5016_s0 + $0x1a0] sm:$0x40]   ;;  %v1430_v35 = vsel %vm109_vm4, %v2530_v31, %v1426_v30  ;;  %v2597_v40 = vld [vmem:[%s5016_s0 + $0xa2] sm:$0x4]  }
  0x81   :  { %v189_v7 = vpop.permute.xlu1 %188   ;;  %v2188_v15 = vld [vmem:[%s5016_s0 + $0x180] ss:$16 sm:%s70_s19]   ;;  %2185 = vst.msk [vmem:[%s5017_s1 + $0x4] ss:$8 sm:$0xf] %vm16_vm10, %v60_v17   ;;  %v1434_v38 = vsel %vm113_vm5, %v2531_v32, %v1430_v35  ;;  %v1696_v47 = vsel %vm97_vm1, %v2597_v40, %v1692_v43  ;;  %s2746_s15 = smov 16  }
  0x82   :  { %1578 = vrot.lane.b32.xlu0 %v1577_v2, %s2743_s8  ;;  %v73_v18 = vsel %vm6_vm7, %v2188_v15, %v2187_v14  ;;  %v2189_v19 = vld [vmem:[%s5016_s0 + $0x180] ss:$16 sm:%s75_s3]   ;;  %2186 = vst.msk [vmem:[%s5017_s1 - $0x1b] ss:$8 sm:$0xf0] %vm16_vm10, %v60_v17   ;;  %vm677_vm15 = vcmask 786112  }
  0x83   :  { %v2190_v20 = vld [vmem:[%s5016_s0 + $0x180] ss:$16 sm:%s80_s28]   ;;  %v78_v21 = vsel %vm10_vm8, %v2189_v19, %v73_v18  ;;  %v2532_v36 = vld [vmem:[%s5016_s0 + $0x1df] sm:$0x80]   ;;  %v2598_v44 = vld [vmem:[%s5016_s0 + $0xe1] sm:$0x8]  }
  0x84   :  { %v120_v16 = vpop.permute.xlu0 %119   ;;  %v83_v23 = vsel %vm14_vm9, %v2190_v20, %v78_v21  ;;  %v1438_v42 = vsel %vm117_vm6, %v2532_v36, %v1434_v38  ;;  %v2599_v45 = vld [vmem:[%s5016_s0 + $0x120] sm:$0x10]   ;;  %v1700_v51 = vsel %vm101_vm2, %v2598_v44, %v1696_v47  ;;  %v2587_v52 = vld [vmem:[%s5016_s0 + $0x53] sm:$0x2]   ;;  %v2551_v63 = vld [vmem:[%s5016_s0 + $0x15] sm:$0x1]  }
  0x85   :  { %2191 = vst.msk [vmem:[%s5017_s1 + $0x6] ss:$8 sm:$0xf] %vm16_vm10, %v83_v23   ;;  %v4227_v34 = vpop.permute.xlu2 %397   ;;  %v2600_v46 = vld [vmem:[%s5016_s0 + $0x15f] sm:$0x20]   ;;  %1439 = vrot.lane.b32.xlu2 %v1438_v42, %s2742_s13  ;;  %v1704_v55 = vsel %vm105_vm3, %v2599_v45, %v1700_v51  ;;  %vm816_vm7 = vcmask 720512  }
  0x86   :  { %2192 = vst.msk [vmem:[%s5017_s1 - $0x19] ss:$8 sm:$0xf0] %vm16_vm10, %v83_v23   ;;  %v2601_v48 = vld [vmem:[%s5016_s0 + $0x19e] sm:$0x40]   ;;  %v1708_v60 = vsel %vm109_vm4, %v2600_v46, %v1704_v55  ;;  %s2747_s24 = smov 8  }
  0x87   :  { %2218 = vst.msk [vmem:[%s5017_s1 + $0x10] sm:$0xff] %vm121_vm11, %v189_v7   ;;  %v2602_v49 = vld [vmem:[%s5016_s0 + $0x1dd] sm:$0x80]   ;;  %v2588_v53 = vld [vmem:[%s5016_s0 + $0x92] sm:$0x4]   ;;  %v1712_v0 = vsel %vm113_vm5, %v2601_v48, %v1708_v60  ;;  %vm955_vm8 = vcmask 654912  }
  0x88   :  { %122 = vst.msk [vmem:[%s5017_s1] sm:$0xff] %vm121_vm11, %v120_v16   ;;  %v2589_v54 = vld [vmem:[%s5016_s0 + $0xd1] sm:$0x8]   ;;  %v2552_v2 = vld [vmem:[%s5016_s0 + $0x54] sm:$0x2]   ;;  %v1716_v5 = vsel %vm117_vm6, %v2602_v49, %v1712_v0  ;;  %vm2067_vm9 = vcmask 130112  }
  0x89   :  { %v224_v33 = vpop.permute.xlu1 %223   ;;  %261 = vst.msk [vmem:[%s5017_s1] sm:$0xff] %vm260_vm12, %v4096_v50   ;;  %v2586_v50 = vld [vmem:[%s5016_s0 + $0x14] sm:$0x1]   ;;  %v2553_v3 = vld [vmem:[%s5016_s0 + $0x93] sm:$0x4]   ;;  %v1518_v7 = vsel %vm93_vm0, %v2552_v2, %v2551_v63  ;;  %1717 = vrot.lane.b32.xlu1 %v1716_v5, %s2744_s11 }
  0x8a   :  { %v1657_v56 = vsel %vm93_vm0, %v2587_v52, %v2586_v50  ;;  %v2590_v57 = vld [vmem:[%s5016_s0 + $0x110] sm:$0x10]   ;;  %2227 = vst.msk [vmem:[%s5017_s1 + $0x18] sm:$0xff] %vm121_vm11, %v224_v33   ;;  %v2554_v8 = vld [vmem:[%s5016_s0 + $0xd2] sm:$0x8]   ;;  %v1522_v14 = vsel %vm97_vm1, %v2553_v3, %v1518_v7 }
  0x8b   :  { %v2591_v58 = vld [vmem:[%s5016_s0 + $0x14f] sm:$0x20]   ;;  %v1661_v61 = vsel %vm97_vm1, %v2588_v53, %v1657_v56  ;;  %v2555_v10 = vld [vmem:[%s5016_s0 + $0x111] sm:$0x10]   ;;  %v1526_v18 = vsel %vm101_vm2, %v2554_v8, %v1522_v14  ;;  %v2621_v19 = vld [vmem:[%s5016_s0 + $0x13] sm:$0x1]  }
  0x8c   :  { %v154_v41 = vpop.permute.xlu0 %153   ;;  %v2592_v59 = vld [vmem:[%s5016_s0 + $0x18e] sm:$0x40]   ;;  %v1665_v1 = vsel %vm101_vm2, %v2589_v54, %v1661_v61  ;;  %v2556_v11 = vld [vmem:[%s5016_s0 + $0x150] sm:$0x20]   ;;  %v2622_v20 = vld [vmem:[%s5016_s0 + $0x52] sm:$0x2]   ;;  %v1530_v23 = vsel %vm105_vm3, %v2555_v10, %v1526_v18 }
  0x8d   :  { %v2593_v62 = vld [vmem:[%s5016_s0 + $0x1cd] sm:$0x80]   ;;  %2209 = vst.msk [vmem:[%s5017_s1 + $0x8] sm:$0xff] %vm121_vm11, %v154_v41   ;;  %v1669_v6 = vsel %vm105_vm3, %v2590_v57, %v1665_v1  ;;  %v4331_v12 = vpop.permute.xlu2 %501   ;;  %v2557_v15 = vld [vmem:[%s5016_s0 + $0x18f] sm:$0x40]   ;;  %v1796_v24 = vsel %vm93_vm0, %v2622_v20, %v2621_v19  ;;  %v1534_v28 = vsel %vm109_vm4, %v2556_v11, %v1530_v23 }
  0x8e   :  { %v1673_v13 = vsel %vm109_vm4, %v2591_v58, %v1669_v6  ;;  %v2558_v16 = vld [vmem:[%s5016_s0 + $0x1ce] sm:$0x80]   ;;  %2244 = vst.msk [vmem:[%s5017_s1 + $0x8] sm:$0xff] %vm260_vm12, %v4159_v9   ;;  %v2623_v21 = vld [vmem:[%s5016_s0 + $0x91] sm:$0x4]   ;;  %v1538_v33 = vsel %vm113_vm5, %v2557_v15, %v1534_v28 }
  0x8f   :  { %v1677_v17 = vsel %vm113_vm5, %v2592_v59, %v1673_v13  ;;  %v2624_v25 = vld [vmem:[%s5016_s0 + $0xd0] sm:$0x8]   ;;  %v1800_v29 = vsel %vm97_vm1, %v2623_v21, %v1796_v24  ;;  %v2613_v32 = vld [vmem:[%s5016_s0 + $0x3] sm:$0x1]   ;;  %v1542_v39 = vsel %vm117_vm6, %v2558_v16, %v1538_v33  ;;  %400 = vst.msk [vmem:[%s5017_s1] sm:$0xff] %vm399_vm13, %v4227_v34  }
  0x90   :  { %v1681_v22 = vsel %vm117_vm6, %v2593_v62, %v1677_v17  ;;  %v2625_v26 = vld [vmem:[%s5016_s0 + $0x10f] sm:$0x10]   ;;  %v1804_v35 = vsel %vm101_vm2, %v2624_v25, %v1800_v29  ;;  %v2614_v36 = vld [vmem:[%s5016_s0 + $0x42] sm:$0x2]   ;;  %1543 = vrot.lane.b32.xlu2 %v1542_v39, %s2743_s8  ;;  %v2578_v34 = vld [vmem:[%s5016_s0 + $0x4] sm:$0x1]  }
  0x91   :  { %v363_v4 = vpop.permute.xlu1 %362   ;;  %v2626_v27 = vld [vmem:[%s5016_s0 + $0x14e] sm:$0x20]   ;;  %1682 = vrot.lane.b32.xlu0 %v1681_v22, %s2744_s11  ;;  %v2615_v37 = vld [vmem:[%s5016_s0 + $0x81] sm:$0x4]   ;;  %v1808_v40 = vsel %vm105_vm3, %v2625_v26, %v1804_v35  ;;  %v1762_v41 = vsel %vm93_vm0, %v2614_v36, %v2613_v32  ;;  %v2579_v51 = vld [vmem:[%s5016_s0 + $0x43] sm:$0x2]  }
  0x92   :  { %v2627_v30 = vld [vmem:[%s5016_s0 + $0x18d] sm:$0x40]   ;;  %v2616_v38 = vld [vmem:[%s5016_s0 + $0xc0] sm:$0x8]   ;;  %v1812_v45 = vsel %vm109_vm4, %v2626_v27, %v1808_v40  ;;  %v1766_v46 = vsel %vm97_vm1, %v2615_v37, %v1762_v41  ;;  %2262 = vst.msk [vmem:[%s5017_s1 + $0x18] sm:$0xff] %vm260_vm12, %v363_v4   ;;  %v1623_v56 = vsel %vm93_vm0, %v2579_v51, %v2578_v34 }
  0x93   :  { %v2628_v31 = vld [vmem:[%s5016_s0 + $0x1cc] sm:$0x80]   ;;  %v2617_v42 = vld [vmem:[%s5016_s0 + $0xff] sm:$0x10]   ;;  %v1816_v49 = vsel %vm113_vm5, %v2627_v30, %v1812_v45  ;;  %v1770_v50 = vsel %vm101_vm2, %v2616_v38, %v1766_v46  ;;  %v2580_v52 = vld [vmem:[%s5016_s0 + $0x82] sm:$0x4]  }
  0x94   :  { %v328_v9 = vpop.permute.xlu0 %327   ;;  %v2618_v43 = vld [vmem:[%s5016_s0 + $0x13e] sm:$0x20]   ;;  %v1820_v54 = vsel %vm117_vm6, %v2628_v31, %v1816_v49  ;;  %v1774_v55 = vsel %vm105_vm3, %v2617_v42, %v1770_v50  ;;  %v2581_v57 = vld [vmem:[%s5016_s0 + $0xc1] sm:$0x8]   ;;  %v1627_v61 = vsel %vm97_vm1, %v2580_v52, %v1623_v56  ;;  %v2648_v3 = vld [vmem:[%s5016_s0 + $0x2] sm:$0x1]  }
  0x95   :  { %v2619_v44 = vld [vmem:[%s5016_s0 + $0x17d] sm:$0x40]   ;;  %v4431_v53 = vpop.permute.xlu2 %605   ;;  %2253 = vst.msk [vmem:[%s5017_s1 + $0x10] sm:$0xff] %vm260_vm12, %v328_v9   ;;  %v2582_v58 = vld [vmem:[%s5016_s0 + $0x100] sm:$0x10]   ;;  %1821 = vrot.lane.b32.xlu1 %v1820_v54, %s2745_s21  ;;  %v1778_v60 = vsel %vm109_vm4, %v2618_v43, %v1774_v55  ;;  %v1631_v2 = vsel %vm101_vm2, %v2581_v57, %v1627_v61 }
  0x96   :  { %v2620_v47 = vld [vmem:[%s5016_s0 + $0x1bc] sm:$0x80]   ;;  %v2583_v62 = vld [vmem:[%s5016_s0 + $0x13f] sm:$0x20]   ;;  %v1782_v1 = vsel %vm113_vm5, %v2619_v44, %v1778_v60  ;;  %v2649_v4 = vld [vmem:[%s5016_s0 + $0x41] sm:$0x2]   ;;  %v1635_v7 = vsel %vm105_vm3, %v2582_v58, %v1631_v2 }
  0x97   :  { %v2584_v63 = vld [vmem:[%s5016_s0 + $0x17e] sm:$0x40]   ;;  %v2650_v5 = vld [vmem:[%s5016_s0 + $0x80] sm:$0x4]   ;;  %v1786_v6 = vsel %vm117_vm6, %v2620_v47, %v1782_v1  ;;  %v1901_v8 = vsel %vm93_vm0, %v2649_v4, %v2648_v3  ;;  %v1639_v14 = vsel %vm109_vm4, %v2583_v62, %v1635_v7  ;;  %v2639_v17 = vld [vmem:[%s5016_s0 + $0x33] sm:$0x1]  }
  0x98   :  { %v2585_v0 = vld [vmem:[%s5016_s0 + $0x1bd] sm:$0x80]   ;;  %v2651_v10 = vld [vmem:[%s5016_s0 + $0xbf] sm:$0x8]   ;;  %v1905_v15 = vsel %vm97_vm1, %v2650_v5, %v1901_v8  ;;  %v1643_v18 = vsel %vm113_vm5, %v2584_v63, %v1639_v14  ;;  %v2640_v20 = vld [vmem:[%s5016_s0 + $0x72] sm:$0x2]  }
  0x99   :  { %v467_v48 = vpop.permute.xlu1 %466   ;;  %v2652_v11 = vld [vmem:[%s5016_s0 + $0xfe] sm:$0x10]   ;;  %1787 = vrot.lane.b32.xlu0 %v1786_v6, %s2745_s21  ;;  %v1909_v19 = vsel %vm101_vm2, %v2651_v10, %v1905_v15  ;;  %v2641_v21 = vld [vmem:[%s5016_s0 + $0xb1] sm:$0x4]   ;;  %v1647_v23 = vsel %vm117_vm6, %v2585_v0, %v1643_v18  ;;  %v1866_v25 = vsel %vm93_vm0, %v2640_v20, %v2639_v17  ;;  %2297 = vst.msk [vmem:[%s5017_s1 + $0x18] sm:$0xff] %vm399_vm13, %v4331_v12  }
  0x9a   :  { %v2653_v13 = vld [vmem:[%s5016_s0 + $0x13d] sm:$0x20]   ;;  %v2642_v22 = vld [vmem:[%s5016_s0 + $0xf0] sm:$0x8]   ;;  %v1913_v24 = vsel %vm105_vm3, %v2652_v11, %v1909_v19  ;;  %1648 = vrot.lane.b32.xlu2 %v1647_v23, %s2744_s11  ;;  %v1870_v31 = vsel %vm97_vm1, %v2641_v21, %v1866_v25  ;;  %v2604_v12 = vld [vmem:[%s5016_s0 + $0x34] sm:$0x1]  }
  0x9b   :  { %v2654_v16 = vld [vmem:[%s5016_s0 + $0x17c] sm:$0x40]   ;;  %v2643_v26 = vld [vmem:[%s5016_s0 + $0x12f] sm:$0x10]   ;;  %v1917_v30 = vsel %vm109_vm4, %v2653_v13, %v1913_v24  ;;  %v1874_v36 = vsel %vm101_vm2, %v2642_v22, %v1870_v31  ;;  %2288 = vst.msk [vmem:[%s5017_s1 + $0x10] sm:$0xff] %vm399_vm13, %v467_v48  }
  0x9c   :  { %v432_v59 = vpop.permute.xlu0 %431   ;;  %v2655_v9 = vld [vmem:[%s5016_s0 + $0x1bb] sm:$0x80]   ;;  %v2644_v27 = vld [vmem:[%s5016_s0 + $0x16e] sm:$0x20]   ;;  %v1921_v35 = vsel %vm113_vm5, %v2654_v16, %v1917_v30  ;;  %v2605_v37 = vld [vmem:[%s5016_s0 + $0x73] sm:$0x2]   ;;  %v1878_v41 = vsel %vm105_vm3, %v2643_v26, %v1874_v36 }
  0x9d   :  { %v2645_v28 = vld [vmem:[%s5016_s0 + $0x1ad] sm:$0x40]   ;;  %v4532_v33 = vpop.permute.xlu2 %709   ;;  %v2606_v38 = vld [vmem:[%s5016_s0 + $0xb2] sm:$0x4]   ;;  %v1925_v40 = vsel %vm117_vm6, %v2655_v9, %v1921_v35  ;;  %2279 = vst.msk [vmem:[%s5017_s1 + $0x8] sm:$0xff] %vm399_vm13, %v432_v59   ;;  %v1727_v42 = vsel %vm93_vm0, %v2605_v37, %v2604_v12  ;;  %v1882_v45 = vsel %vm109_vm4, %v2644_v27, %v1878_v41 }
  0x9e   :  { %v2646_v32 = vld [vmem:[%s5016_s0 + $0x1ec] sm:$0x80]   ;;  %v2607_v43 = vld [vmem:[%s5016_s0 + $0xf1] sm:$0x8]   ;;  %1926 = vrot.lane.b32.xlu1 %v1925_v40, %s2746_s15  ;;  %v1731_v46 = vsel %vm97_vm1, %v2606_v38, %v1727_v42  ;;  %v1886_v49 = vsel %vm113_vm5, %v2645_v28, %v1882_v45  ;;  %v2674_v51 = vld [vmem:[%s5016_s0 + $0x32] sm:$0x1]  }
  0x9f   :  { %v2608_v44 = vld [vmem:[%s5016_s0 + $0x130] sm:$0x10]   ;;  %v1735_v50 = vsel %vm101_vm2, %v2607_v43, %v1731_v46  ;;  %v2675_v52 = vld [vmem:[%s5016_s0 + $0x71] sm:$0x2]   ;;  %v1890_v55 = vsel %vm117_vm6, %v2646_v32, %v1886_v49  ;;  %v2665_v1 = vld [vmem:[%s5016_s0 + $0x22] sm:$0x1]  }
  0xa0   :  { %v2609_v47 = vld [vmem:[%s5016_s0 + $0x16f] sm:$0x20]   ;;  %v2676_v54 = vld [vmem:[%s5016_s0 + $0xb0] sm:$0x4]   ;;  %v1739_v56 = vsel %vm105_vm3, %v2608_v44, %v1735_v50  ;;  %v2005_v57 = vsel %vm93_vm0, %v2675_v52, %v2674_v51  ;;  %v2666_v4 = vld [vmem:[%s5016_s0 + $0x61] sm:$0x2]  }
  0xa1   :  { %v4516_v29 = vpop.permute.xlu1 %570   ;;  %v2610_v34 = vld [vmem:[%s5016_s0 + $0x1ae] sm:$0x40]   ;;  %v2677_v58 = vld [vmem:[%s5016_s0 + $0xef] sm:$0x8]   ;;  %1891 = vrot.lane.b32.xlu0 %v1890_v55, %s2745_s21  ;;  %v1743_v61 = vsel %vm109_vm4, %v2609_v47, %v1739_v56  ;;  %v2009_v62 = vsel %vm97_vm1, %v2676_v54, %v2005_v57  ;;  %v2667_v5 = vld [vmem:[%s5016_s0 + $0xa0] sm:$0x4]   ;;  %v1970_v11 = vsel %vm93_vm0, %v2666_v4, %v2665_v1 }
  0xa2   :  { %v2611_v48 = vld [vmem:[%s5016_s0 + $0x1ed] sm:$0x80]   ;;  %v2678_v59 = vld [vmem:[%s5016_s0 + $0x12e] sm:$0x10]   ;;  %v1747_v2 = vsel %vm113_vm5, %v2610_v34, %v1743_v61  ;;  %v2013_v3 = vsel %vm101_vm2, %v2677_v58, %v2009_v62  ;;  %v2668_v6 = vld [vmem:[%s5016_s0 + $0xdf] sm:$0x8]   ;;  %v1974_v17 = vsel %vm97_vm1, %v2667_v5, %v1970_v11 }
  0xa3   :  { %v2679_v60 = vld [vmem:[%s5016_s0 + $0x16d] sm:$0x20]   ;;  %v1751_v8 = vsel %vm117_vm6, %v2611_v48, %v1747_v2  ;;  %v2017_v10 = vsel %vm105_vm3, %v2678_v59, %v2013_v3  ;;  %v2669_v13 = vld [vmem:[%s5016_s0 + $0x11e] sm:$0x10]   ;;  %2323 = vst.msk [vmem:[%s5017_s1 + $0x10] sm:$0xff] %vm538_vm14, %v4431_v53   ;;  %v1978_v21 = vsel %vm101_vm2, %v2668_v6, %v1974_v17 }
  0xa4   :  { %v537_v39 = vpop.permute.xlu0 %536   ;;  %v2680_v63 = vld [vmem:[%s5016_s0 + $0x1ac] sm:$0x40]   ;;  %v2670_v14 = vld [vmem:[%s5016_s0 + $0x15d] sm:$0x20]   ;;  %1752 = vrot.lane.b32.xlu2 %v1751_v8, %s2744_s11  ;;  %v2021_v9 = vsel %vm109_vm4, %v2679_v60, %v2017_v10  ;;  %v2630_v53 = vld [vmem:[%s5016_s0 + $0x23] sm:$0x1]   ;;  %v1982_v25 = vsel %vm105_vm3, %v2669_v13, %v1978_v21 }
  0xa5   :  { %v2681_v0 = vld [vmem:[%s5016_s0 + $0x1eb] sm:$0x80]   ;;  %v2671_v15 = vld [vmem:[%s5016_s0 + $0x19c] sm:$0x40]   ;;  %v4631_v16 = vpop.permute.xlu2 %814   ;;  %v2025_v20 = vsel %vm113_vm5, %v2680_v63, %v2021_v9  ;;  %2314 = vst.msk [vmem:[%s5017_s1 + $0x8] sm:$0xff] %vm538_vm14, %v4516_v29   ;;  %v1986_v29 = vsel %vm109_vm4, %v2670_v14, %v1982_v25 }
  0xa6   :  { %v2672_v18 = vld [vmem:[%s5016_s0 + $0x1db] sm:$0x80]   ;;  %v2631_v22 = vld [vmem:[%s5016_s0 + $0x62] sm:$0x2]   ;;  %v2029_v24 = vsel %vm117_vm6, %v2681_v0, %v2025_v20  ;;  %539 = vst.msk [vmem:[%s5017_s1] sm:$0xff] %vm538_vm14, %v537_v39   ;;  %v1990_v35 = vsel %vm113_vm5, %v2671_v15, %v1986_v29 }
  0xa7   :  { %v2632_v23 = vld [vmem:[%s5016_s0 + $0xa1] sm:$0x4]   ;;  %v1831_v26 = vsel %vm93_vm0, %v2631_v22, %v2630_v53  ;;  %2030 = vrot.lane.b32.xlu1 %v2029_v24, %s2746_s15  ;;  %v2700_v37 = vld [vmem:[%s5016_s0 + $0x21] sm:$0x1]   ;;  %v1994_v40 = vsel %vm117_vm6, %v2672_v18, %v1990_v35  ;;  %v2691_v49 = vld [vmem:[%s5016_s0 + $0x11] sm:$0x1]  }
  0xa8   :  { %v2633_v27 = vld [vmem:[%s5016_s0 + $0xe0] sm:$0x8]   ;;  %v1835_v30 = vsel %vm97_vm1, %v2632_v23, %v1831_v26  ;;  %v2701_v38 = vld [vmem:[%s5016_s0 + $0x60] sm:$0x2]   ;;  %v2692_v54 = vld [vmem:[%s5016_s0 + $0x50] sm:$0x2]  }
  0xa9   :  { %v4617_v7 = vpop.permute.xlu1 %675   ;;  %v2634_v28 = vld [vmem:[%s5016_s0 + $0x11f] sm:$0x10]   ;;  %v1839_v36 = vsel %vm101_vm2, %v2633_v27, %v1835_v30  ;;  %v2702_v39 = vld [vmem:[%s5016_s0 + $0x9f] sm:$0x4]   ;;  %v2109_v42 = vsel %vm93_vm0, %v2701_v38, %v2700_v37  ;;  %1995 = vrot.lane.b32.xlu0 %v1994_v40, %s2746_s15  ;;  %v2693_v55 = vld [vmem:[%s5016_s0 + $0x8f] sm:$0x4]   ;;  %v2074_v60 = vsel %vm93_vm0, %v2692_v54, %v2691_v49 }
  0xaa   :  { %v2635_v31 = vld [vmem:[%s5016_s0 + $0x15e] sm:$0x20]   ;;  %v1843_v41 = vsel %vm105_vm3, %v2634_v28, %v1839_v36  ;;  %v2703_v43 = vld [vmem:[%s5016_s0 + $0xde] sm:$0x8]   ;;  %v2113_v47 = vsel %vm97_vm1, %v2702_v39, %v2109_v42  ;;  %v2694_v56 = vld [vmem:[%s5016_s0 + $0xce] sm:$0x8]   ;;  %v2078_v2 = vsel %vm97_vm1, %v2693_v55, %v2074_v60 }
  0xab   :  { %v2636_v32 = vld [vmem:[%s5016_s0 + $0x19d] sm:$0x40]   ;;  %v2704_v44 = vld [vmem:[%s5016_s0 + $0x11d] sm:$0x10]   ;;  %v1847_v46 = vsel %vm109_vm4, %v2635_v31, %v1843_v41  ;;  %v2117_v52 = vsel %vm101_vm2, %v2703_v43, %v2113_v47  ;;  %v2695_v61 = vld [vmem:[%s5016_s0 + $0x10d] sm:$0x10]   ;;  %v2082_v5 = vsel %vm101_vm2, %v2694_v56, %v2078_v2 }
  0xac   :  { %v4647_v19 = vpop.permute.xlu0 %640   ;;  %v2637_v12 = vld [vmem:[%s5016_s0 + $0x1dc] sm:$0x80]   ;;  %v2705_v45 = vld [vmem:[%s5016_s0 + $0x15c] sm:$0x20]   ;;  %v1851_v51 = vsel %vm113_vm5, %v2636_v32, %v1847_v46  ;;  %v2121_v59 = vsel %vm105_vm3, %v2704_v44, %v2117_v52  ;;  %v2696_v62 = vld [vmem:[%s5016_s0 + $0x14c] sm:$0x20]   ;;  %v2086_v10 = vsel %vm105_vm3, %v2695_v61, %v2082_v5 }
  0xad   :  { %v2706_v34 = vld [vmem:[%s5016_s0 + $0x19b] sm:$0x40]   ;;  %v919_v57 = vpop.permute.xlu2 %918   ;;  %v1855_v58 = vsel %vm117_vm6, %v2637_v12, %v1851_v51  ;;  %v2697_v63 = vld [vmem:[%s5016_s0 + $0x18b] sm:$0x40]   ;;  %v2125_v1 = vsel %vm109_vm4, %v2705_v45, %v2121_v59  ;;  %2349 = vst.msk [vmem:[%s5017_s1 + $0x8] sm:$0xff] %vm677_vm15, %v4532_v33   ;;  %v2090_v15 = vsel %vm109_vm4, %v2696_v62, %v2086_v10 }
  0xae   :  { %v2707_v48 = vld [vmem:[%s5016_s0 + $0x1da] sm:$0x80]   ;;  %1856 = vrot.lane.b32.xlu2 %v1855_v58, %s2745_s21  ;;  %v2698_v3 = vld [vmem:[%s5016_s0 + $0x1ca] sm:$0x80]   ;;  %v2656_v33 = vld [vmem:[%s5016_s0 + $0x12] sm:$0x1]   ;;  %v2129_v4 = vsel %vm113_vm5, %v2706_v34, %v2125_v1 }
  0xaf   :  { %678 = vst.msk [vmem:[%s5017_s1] sm:$0xff] %vm677_vm15, %v4617_v7   ;;  %v2657_v6 = vld [vmem:[%s5016_s0 + $0x51] sm:$0x2]   ;;  %v2133_v8 = vsel %vm117_vm6, %v2707_v48, %v2129_v4  ;;  %v2684_v21 = vld [vmem:[%s5016_s0 + $0x40] sm:$0x2]  }
  0xb0   :  { %v2658_v7 = vld [vmem:[%s5016_s0 + $0x90] sm:$0x4]   ;;  %2332 = vst.msk [vmem:[%s5017_s1 + $0x18] sm:$0xff] %vm538_vm14, %v4647_v19   ;;  %v1935_v11 = vsel %vm93_vm0, %v2657_v6, %v2656_v33  ;;  %2134 = vrot.lane.b32.xlu1 %v2133_v8, %s2747_s24  ;;  %v2094_v19 = vsel %vm113_vm5, %v2697_v63, %v2090_v15  ;;  %v2685_v25 = vld [vmem:[%s5016_s0 + $0x7f] sm:$0x4]  }
  0xb1   :  { %v780_v50 = vpop.permute.xlu1 %779   ;;  %v2659_v13 = vld [vmem:[%s5016_s0 + $0xcf] sm:$0x8]   ;;  %v1939_v9 = vsel %vm97_vm1, %v2658_v7, %v1935_v11  ;;  %817 = vst.msk [vmem:[%s5017_s1] sm:$0xff] %vm816_vm7, %v4631_v16   ;;  %v2683_v16 = vld [vmem:[%s5016_s0 + $0x1] sm:$0x1]   ;;  %v2098_v22 = vsel %vm117_vm6, %v2698_v3, %v2094_v19 }
  0xb2   :  { %v2660_v14 = vld [vmem:[%s5016_s0 + $0x10e] sm:$0x10]   ;;  %v1943_v20 = vsel %vm101_vm2, %v2659_v13, %v1939_v9  ;;  %2367 = vst.msk [vmem:[%s5017_s1 + $0x18] sm:$0xff] %vm677_vm15, %v780_v50   ;;  %v2040_v24 = vsel %vm93_vm0, %v2684_v21, %v2683_v16  ;;  %v2686_v26 = vld [vmem:[%s5016_s0 + $0xbe] sm:$0x8]   ;;  %2099 = vrot.lane.b32.xlu0 %v2098_v22, %s2747_s24 }
  0xb3   :  { %v2661_v17 = vld [vmem:[%s5016_s0 + $0x14d] sm:$0x20]   ;;  %v1947_v23 = vsel %vm105_vm3, %v2660_v14, %v1943_v20  ;;  %v2044_v29 = vsel %vm97_vm1, %v2685_v25, %v2040_v24  ;;  %v2687_v30 = vld [vmem:[%s5016_s0 + $0xfd] sm:$0x10]   ;;  %2402 = vst.msk [vmem:[%s5017_s1 + $0x18] sm:$0xff] %vm816_vm7, %v919_v57  }
  0xb4   :  { %v745_v0 = vpop.permute.xlu0 %744   ;;  %v2662_v18 = vld [vmem:[%s5016_s0 + $0x18c] sm:$0x40]   ;;  %v1951_v28 = vsel %vm109_vm4, %v2661_v17, %v1947_v23  ;;  %v2688_v31 = vld [vmem:[%s5016_s0 + $0x13c] sm:$0x20]   ;;  %v2048_v35 = vsel %vm101_vm2, %v2686_v26, %v2044_v29  ;;  %v2709_v40 = vld [vmem:[%s5016_s0 + $0x31] sm:$0x1]  }
  0xb5   :  { %v2663_v53 = vld [vmem:[%s5016_s0 + $0x1cb] sm:$0x80]   ;;  %2358 = vst.msk [vmem:[%s5017_s1 + $0x10] sm:$0xff] %vm677_vm15, %v745_v0   ;;  %v1023_v32 = vpop.permute.xlu2 %1022   ;;  %v1955_v12 = vsel %vm113_vm5, %v2662_v18, %v1951_v28  ;;  %v2689_v36 = vld [vmem:[%s5016_s0 + $0x17b] sm:$0x40]   ;;  %v2052_v39 = vsel %vm105_vm3, %v2687_v30, %v2048_v35 }
  0xb6   :  { %v1959_v38 = vsel %vm117_vm6, %v2663_v53, %v1955_v12  ;;  %v2710_v41 = vld [vmem:[%s5016_s0 + $0x70] sm:$0x2]   ;;  %v2056_v42 = vsel %vm109_vm4, %v2688_v31, %v2052_v39  ;;  %v2690_v48 = vld [vmem:[%s5016_s0 + $0x1ba] sm:$0x80]  }
  0xb7   :  { %1960 = vrot.lane.b32.xlu2 %v1959_v38, %s2746_s15  ;;  %v2144_v43 = vsel %vm93_vm0, %v2710_v41, %v2709_v40  ;;  %v2711_v44 = vld [vmem:[%s5016_s0 + $0xaf] sm:$0x4]   ;;  %v2060_v34 = vsel %vm113_vm5, %v2689_v36, %v2056_v42  ;;  %vm1094_vm0 = vcmask 589312  }
  0xb8   :  { %v2712_v45 = vld [vmem:[%s5016_s0 + $0xee] sm:$0x8]   ;;  %v2148_v46 = vsel %vm97_vm1, %v2711_v44, %v2144_v43  ;;  %v2064_v54 = vsel %vm117_vm6, %v2690_v48, %v2060_v34  ;;  %vm1233_vm1 = vcmask 523712  }
  0xb9   :  { %v884_v27 = vpop.permute.xlu1 %883   ;;  %v2713_v47 = vld [vmem:[%s5016_s0 + $0x12d] sm:$0x10]   ;;  %v2152_v49 = vsel %vm101_vm2, %v2712_v45, %v2148_v46  ;;  %vm1372_vm2 = vcmask 458112  }
  0xba   :  { %2393 = vst.msk [vmem:[%s5017_s1 + $0x10] sm:$0xff] %vm816_vm7, %v884_v27   ;;  %v2156_v50 = vsel %vm105_vm3, %v2713_v47, %v2152_v49  ;;  %v2714_v51 = vld [vmem:[%s5016_s0 + $0x16c] sm:$0x20]   ;;  %vm1511_vm3 = vcmask 392512  }
  0xbb   :  { %2428 = vst.msk [vmem:[%s5017_s1 + $0x10] sm:$0xff] %vm955_vm8, %v1023_v32   ;;  %v2160_v57 = vsel %vm109_vm4, %v2714_v51, %v2156_v50  ;;  %v2715_v58 = vld [vmem:[%s5016_s0 + $0x1ab] sm:$0x40]   ;;  %vm1650_vm4 = vcmask 326912  }
  0xbc   :  { %v849_v37 = vpop.permute.xlu0 %848   ;;  %v2164_v59 = vsel %vm113_vm5, %v2715_v58, %v2160_v57  ;;  %v2716_v60 = vld [vmem:[%s5016_s0 + $0x1ea] sm:$0x80]   ;;  %vm1789_vm5 = vcmask 261312  }
  0xbd   :  { %2384 = vst.msk [vmem:[%s5017_s1 + $0x8] sm:$0xff] %vm816_vm7, %v849_v37   ;;  %v1127_v55 = vpop.permute.xlu2 %1126   ;;  %v2168_v62 = vsel %vm117_vm6, %v2716_v60, %v2164_v59  ;;  %vm1928_vm6 = vcmask 195712  }
  0xbf   :  { %2065 = vrot.lane.b32.xlu2 %v2064_v54, %s2747_s24 }
  0xc1   :  { %v988_v52 = vpop.permute.xlu1 %987  }
  0xc2   :  { %2419 = vst.msk [vmem:[%s5017_s1 + $0x8] sm:$0xff] %vm955_vm8, %v988_v52  }
  0xc3   :  { %2454 = vst.msk [vmem:[%s5017_s1 + $0x8] sm:$0xff] %vm1094_vm0, %v1127_v55  }
  0xc4   :  { %v954_v56 = vpop.permute.xlu0 %953  }
  0xc5   :  { %956 = vst.msk [vmem:[%s5017_s1] sm:$0xff] %vm955_vm8, %v954_v56   ;;  %v1232_v63 = vpop.permute.xlu2 %1231  }
  0xc7   :  { %2169 = vrot.lane.b32.xlu2 %v2168_v62, %s2747_s24 }
  0xc9   :  { %v1093_v61 = vpop.permute.xlu1 %1092  }
  0xca   :  { %1095 = vst.msk [vmem:[%s5017_s1] sm:$0xff] %vm1094_vm0, %v1093_v61  }
  0xcb   :  { %1234 = vst.msk [vmem:[%s5017_s1] sm:$0xff] %vm1233_vm1, %v1232_v63  }
  0xcc   :  { %v1058_v0 = vpop.permute.xlu0 %1057  }
  0xcd   :  { %2437 = vst.msk [vmem:[%s5017_s1 + $0x18] sm:$0xff] %vm955_vm8, %v1058_v0   ;;  %v1336_v2 = vpop.permute.xlu2 %1335  }
  0xd1   :  { %v1197_v1 = vpop.permute.xlu1 %1196  }
  0xd2   :  { %2472 = vst.msk [vmem:[%s5017_s1 + $0x18] sm:$0xff] %vm1094_vm0, %v1197_v1  }
  0xd3   :  { %2507 = vst.msk [vmem:[%s5017_s1 + $0x18] sm:$0xff] %vm1233_vm1, %v1336_v2  }
  0xd4   :  { %v1162_v3 = vpop.permute.xlu0 %1161  }
  0xd5   :  { %2463 = vst.msk [vmem:[%s5017_s1 + $0x10] sm:$0xff] %vm1094_vm0, %v1162_v3  }
  0xd9   :  { %v1301_v33 = vpop.permute.xlu1 %1300  }
  0xda   :  { %2498 = vst.msk [vmem:[%s5017_s1 + $0x10] sm:$0xff] %vm1233_vm1, %v1301_v33  }
  0xdc   :  { %v1266_v4 = vpop.permute.xlu0 %1265  }
  0xdd   :  { %2489 = vst.msk [vmem:[%s5017_s1 + $0x8] sm:$0xff] %vm1233_vm1, %v1266_v4  }
  0xdf   :  { %v1440_v7 = vpop.permute.xlu2 %1439  }
  0xe0   :  { %2533 = vst.msk [vmem:[%s5017_s1 + $0x10] sm:$0xff] %vm1372_vm2, %v1440_v7  }
  0xe1   :  { %v1405_v5 = vpop.permute.xlu1 %1404  }
  0xe2   :  { %2524 = vst.msk [vmem:[%s5017_s1 + $0x8] sm:$0xff] %vm1372_vm2, %v1405_v5  }
  0xe4   :  { %v1371_v6 = vpop.permute.xlu0 %1370  }
  0xe5   :  { %1373 = vst.msk [vmem:[%s5017_s1] sm:$0xff] %vm1372_vm2, %v1371_v6  }
  0xe9   :  { %v1510_v8 = vpop.permute.xlu1 %1509  }
  0xea   :  { %1512 = vst.msk [vmem:[%s5017_s1] sm:$0xff] %vm1511_vm3, %v1510_v8   ;;  %v1544_v13 = vpop.permute.xlu2 %1543  }
  0xeb   :  { %2559 = vst.msk [vmem:[%s5017_s1 + $0x8] sm:$0xff] %vm1511_vm3, %v1544_v13  }
  0xec   :  { %v1475_v10 = vpop.permute.xlu0 %1474  }
  0xed   :  { %2542 = vst.msk [vmem:[%s5017_s1 + $0x18] sm:$0xff] %vm1372_vm2, %v1475_v10  }
  0xf1   :  { %v1614_v11 = vpop.permute.xlu1 %1613  }
  0xf2   :  { %2577 = vst.msk [vmem:[%s5017_s1 + $0x18] sm:$0xff] %vm1511_vm3, %v1614_v11  }
  0xf4   :  { %v1579_v14 = vpop.permute.xlu0 %1578   ;;  %v1649_v15 = vpop.permute.xlu2 %1648  }
  0xf5   :  { %2568 = vst.msk [vmem:[%s5017_s1 + $0x10] sm:$0xff] %vm1511_vm3, %v1579_v14  }
  0xf6   :  { %1651 = vst.msk [vmem:[%s5017_s1] sm:$0xff] %vm1650_vm4, %v1649_v15  }
  0xfb   :  { %v1718_v17 = vpop.permute.xlu1 %1717  }
  0xfc   :  { %2603 = vst.msk [vmem:[%s5017_s1 + $0x10] sm:$0xff] %vm1650_vm4, %v1718_v17  }
  0xfe   :  { %v1753_v9 = vpop.permute.xlu2 %1752  }
  0xff   :  { %2612 = vst.msk [vmem:[%s5017_s1 + $0x18] sm:$0xff] %vm1650_vm4, %v1753_v9  }
 0x103   :  { %v1683_v18 = vpop.permute.xlu0 %1682  }
 0x104   :  { %2594 = vst.msk [vmem:[%s5017_s1 + $0x8] sm:$0xff] %vm1650_vm4, %v1683_v18  }
 0x107   :  { %v1822_v19 = vpop.permute.xlu1 %1821  }
 0x108   :  { %v1857_v53 = vpop.permute.xlu2 %1856   ;;  %2629 = vst.msk [vmem:[%s5017_s1 + $0x8] sm:$0xff] %vm1789_vm5, %v1822_v19  }
 0x109   :  { %2638 = vst.msk [vmem:[%s5017_s1 + $0x10] sm:$0xff] %vm1789_vm5, %v1857_v53  }
 0x10b   :  { %v1788_v20 = vpop.permute.xlu0 %1787  }
 0x10c   :  { %1790 = vst.msk [vmem:[%s5017_s1] sm:$0xff] %vm1789_vm5, %v1788_v20  }
 0x110   :  { %v1927_v21 = vpop.permute.xlu1 %1926  }
 0x111   :  { %v1961_v16 = vpop.permute.xlu2 %1960   ;;  %1929 = vst.msk [vmem:[%s5017_s1] sm:$0xff] %vm1928_vm6, %v1927_v21  }
 0x112   :  { %2664 = vst.msk [vmem:[%s5017_s1 + $0x8] sm:$0xff] %vm1928_vm6, %v1961_v16  }
 0x113   :  { %v1892_v22 = vpop.permute.xlu0 %1891  }
 0x114   :  { %2647 = vst.msk [vmem:[%s5017_s1 + $0x18] sm:$0xff] %vm1789_vm5, %v1892_v22  }
 0x119   :  { %v2066_v23 = vpop.permute.xlu2 %2065   ;;  %v2031_v24 = vpop.permute.xlu1 %2030  }
 0x11a   :  { %2068 = vst.msk [vmem:[%s5017_s1] sm:$0xff] %vm2067_vm9, %v2066_v23  }
 0x11b   :  { %2682 = vst.msk [vmem:[%s5017_s1 + $0x18] sm:$0xff] %vm1928_vm6, %v2031_v24   ;;  %v1996_v25 = vpop.permute.xlu0 %1995  }
 0x11c   :  { %2673 = vst.msk [vmem:[%s5017_s1 + $0x10] sm:$0xff] %vm1928_vm6, %v1996_v25  }
 0x121   :  { %v2170_v26 = vpop.permute.xlu2 %2169  }
 0x122   :  { %2717 = vst.msk [vmem:[%s5017_s1 + $0x18] sm:$0xff] %vm2067_vm9, %v2170_v26   ;;  %v2135_v27 = vpop.permute.xlu1 %2134  }
 0x123   :  { %2708 = vst.msk [vmem:[%s5017_s1 + $0x10] sm:$0xff] %vm2067_vm9, %v2135_v27  }
 0x124   :  { %v2100_v28 = vpop.permute.xlu0 %2099  }
 0x125   :  { %2699 = vst.msk [vmem:[%s5017_s1 + $0x8] sm:$0xff] %vm2067_vm9, %v2100_v28  }

// kernel: apply_merged_unitary.1
= control target key start
LH: loop header
LB: loop body
LE: loop exit
PB: predicated region body
PF: predicated region fallthrough
CT: control target
= control target key end

     0   :  { %s909_s21 = smov 0   ;;  %s911_s22 = smov 0   ;;  %s1026_s0 = inlined_call_operand.vmem [shape: f32[8,512], index: 0, kind: input, shape index: {}]   ;;  %s1027_s1 = inlined_call_operand.vmem [shape: f32[8,1024], index: 1, kind: input, shape index: {}, may-alias: {1,2}]   ;;  %s1028_s2 = inlined_call_operand.vmem [shape: f32[8,1024], index: 2, kind: input, shape index: {}, may-alias: {1,2}]   ;;  %s1029_s3 = inlined_call_operand.vmem [shape: f32[8,1024], index: 3, kind: input, shape index: {}, may-alias: {3,4}]   ;;  %s1030_s4 = inlined_call_operand.vmem [shape: f32[8,1024], index: 4, kind: input, shape index: {}, may-alias: {3,4}]   ;;  %s1031_s5 = inlined_call_operand.vmem [shape: f32[8,1024], index: 5, kind: output, shape index: {0}]   ;;  %s1032_s6 = inlined_call_operand.vmem [shape: f32[8,1024], index: 6, kind: output, shape index: {1}]  }
   0x1   :  { %s913_s23 = smov 0  }
   0x2 LB: > { %s29_s24 = sadd.s32 1, %s868_s22  ;;  %p811_p0 = scmp.ge.s32.totalorder %s872_s23, 1  ;;  %s872_s23 = sphi %s913_s23, %s17_s23   ;;  %s868_s22 = sphi %s911_s22, %s1034_s22   ;;  %s864_s21 = sphi %s909_s21, %s1033_s21  }
   0x3   : > { %p30_p1 = scmp.ge.s32.totalorder %s29_s24, 2  ;;  %p308_p2 = scmp.lt.s32.totalorder %s872_s23, 3 }
   0x5   : > { %s1036_s24 = smov (%p30_p1, %s29_s24), 0  ;;  %p309_p3 = pnand %p811_p0, %p308_p2 }
   0x6   : > { %s458_s27 = scvt.s32.f32 (!%p309_p3), %s864_s21  ;;  %s812_s8 = sshll.u32 (!%p309_p3), %s864_s21, 2 }
   0x7   : > { %312 = sbr.rel (%p309_p3) target bundleno = 47 (0x2f), region = 40  ;;  %p434_p4 = scmp.lt.s32.totalorder (!%p309_p3), %s812_s8, 7 }
   0xc   : > { %v454_v0 = vld [vmem:[%s1026_s0] sm:$0xff]  ;;  %v455_v2 = vld [vmem:[%s1026_s0 + $0x8] sm:$0xff]  ;;  %v475_v3 = vstv %s458_s27  ;;  %v456_v6 = vld [vmem:[%s1026_s0 + $0x10] sm:$0xff]  ;;  %s1038_s8 = smov (!%p434_p4, %s812_s8), 7 }
   0xd   : > { %v463_v1 = vrot.slane %v454_v0, 4  ;;  %v464_v4 = vrot.slane %v455_v2, 4  ;;  %v465_v8 = vrot.slane %v456_v6, 4  ;;  %v943_v10 = vld [vmem:[%s1026_s0 + $0x18] sm:$0xff]  ;;  %v496_v19 = vld [vmem:[%s1027_s1] sm:$0xff]  ;;  %v497_v30 = vld [vmem:[%s1027_s1 + $0x8] sm:$0xff] }
   0xe   : > { %v466_v13 = vrot.slane %v943_v10, 4  ;;  %v816_v20 = vld [vmem:[%s1028_s2 + $0x20] sm:$0xff]  ;;  %v817_v31 = vld [vmem:[%s1028_s2 + $0x28] sm:$0xff]  ;;  %s813_s30 = sshll.u32 %s1038_s8, 3 }
   0xf   : > { %v471_v5 = vsub.f32 %v454_v0, %v463_v1  ;;  %v472_v7 = vsub.f32 %v455_v2, %v464_v4  ;;  %v473_v12 = vsub.f32 %v456_v6, %v465_v8  ;;  %v504_v21 = vld [vmem:[%s1029_s3] sm:$0xff]  ;;  %v505_v32 = vld [vmem:[%s1029_s3 + $0x8] sm:$0xff]  ;;  %s977_s10 = scalar_lea.vmem %s1031_s5, %s813_s30  ;;  %s982_s12 = scalar_lea.vmem %s1032_s6, %s813_s30  ;;  %v506_v1 = vld [vmem:[%s1029_s3 + $0x10] sm:$0xff] }
  0x10   : > { %v474_v17 = vsub.f32 %v943_v10, %v466_v13  ;;  %v820_v22 = vld [vmem:[%s1030_s4 + $0x20] sm:$0xff]  ;;  %v821_v45 = vld [vmem:[%s1030_s4 + $0x28] sm:$0xff]  ;;  %v818_v4 = vld [vmem:[%s1028_s2 + $0x30] sm:$0xff] }
  0x11   : > { %v476_v9 = vmul.f32 %v475_v3, %v471_v5  ;;  %v477_v11 = vmul.f32 %v475_v3, %v472_v7  ;;  %v478_v16 = vmul.f32 %v475_v3, %v473_v12  ;;  %v822_v5 = vld [vmem:[%s1030_s4 + $0x30] sm:$0xff] }
  0x12   : > { %v479_v25 = vmul.f32 %v475_v3, %v474_v17 }
  0x13   : > { %v484_v14 = vrot.slane %v476_v9, 4  ;;  %v485_v15 = vrot.slane %v477_v11, 4  ;;  %v486_v24 = vrot.slane %v478_v16, 4 }
  0x14   : > { %v487_v61 = vrot.slane %v479_v25, 4 }
  0x15   : > { %v492_v18 = vadd.f32 %v484_v14, %v454_v0  ;;  %v493_v23 = vadd.f32 %v485_v15, %v455_v2  ;;  %v494_v60 = vadd.f32 %v486_v24, %v456_v6  ;;  %v498_v0 = vld [vmem:[%s1027_s1 + $0x10] sm:$0xff] }
  0x16   : > { %v495_v12 = vadd.f32 %v487_v61, %v943_v10 }
  0x17   : > { %v512_v26 = vperm.slane %v492_v18, 0  ;;  %v520_v27 = vperm.slane %v492_v18, 2  ;;  %v532_v28 = vperm.slane %v492_v18, 1  ;;  %v544_v29 = vperm.slane %v492_v18, 3 }
  0x18   : > { %v513_v33 = vperm.slane %v493_v23, 0  ;;  %v521_v34 = vperm.slane %v493_v23, 2  ;;  %v533_v35 = vperm.slane %v493_v23, 1  ;;  %v545_v36 = vperm.slane %v493_v23, 3  ;;  %v819_v23 = vld [vmem:[%s1028_s2 + $0x38] sm:$0xff] }
  0x19   : > { %v516_v37 = vmul.f32 %v512_v26, %v496_v19  ;;  %v524_v38 = vmul.f32 %v520_v27, %v504_v21  ;;  %v536_v39 = vmul.f32 %v816_v20, %v532_v28  ;;  %v548_v40 = vmul.f32 %v820_v22, %v544_v29 }
  0x1a   : > { %v560_v41 = vmul.f32 %v512_v26, %v504_v21  ;;  %v564_v42 = vmul.f32 %v520_v27, %v496_v19  ;;  %v572_v43 = vmul.f32 %v820_v22, %v532_v28  ;;  %v580_v44 = vmul.f32 %v816_v20, %v544_v29  ;;  %v499_v20 = vld [vmem:[%s1027_s1 + $0x18] sm:$0xff] }
  0x1b   : > { %v528_v46 = vsub.f32 %v516_v37, %v524_v38  ;;  %v517_v47 = vmul.f32 %v513_v33, %v497_v30  ;;  %v525_v48 = vmul.f32 %v521_v34, %v505_v32  ;;  %v537_v49 = vmul.f32 %v817_v31, %v533_v35  ;;  %v507_v21 = vld [vmem:[%s1029_s3 + $0x18] sm:$0xff] }
  0x1c   : > { %v568_v50 = vadd.f32 %v564_v42, %v560_v41  ;;  %v549_v51 = vmul.f32 %v821_v45, %v545_v36  ;;  %v561_v52 = vmul.f32 %v513_v33, %v505_v32  ;;  %v565_v53 = vmul.f32 %v521_v34, %v497_v30  ;;  %v823_v28 = vld [vmem:[%s1030_s4 + $0x38] sm:$0xff] }
  0x1d   : > { %v540_v54 = vadd.f32 %v536_v39, %v528_v46  ;;  %v529_v55 = vsub.f32 %v517_v47, %v525_v48  ;;  %v573_v56 = vmul.f32 %v821_v45, %v533_v35  ;;  %v581_v57 = vmul.f32 %v817_v31, %v545_v36 }
  0x1e   : > { %v576_v58 = vadd.f32 %v572_v43, %v568_v50  ;;  %v569_v59 = vadd.f32 %v565_v53, %v561_v52  ;;  %v514_v6 = vperm.slane %v494_v60, 0  ;;  %v522_v7 = vperm.slane %v494_v60, 2 }
  0x1f   : > { %v552_v62 = vsub.f32 %v540_v54, %v548_v40  ;;  %v541_v63 = vadd.f32 %v537_v49, %v529_v55  ;;  %v534_v9 = vperm.slane %v494_v60, 1  ;;  %v546_v11 = vperm.slane %v494_v60, 3 }
  0x20   : > { %v584_v2 = vadd.f32 %v580_v44, %v576_v58  ;;  %v577_v3 = vadd.f32 %v573_v56, %v569_v59  ;;  %v518_v14 = vmul.f32 %v514_v6, %v498_v0  ;;  %v526_v15 = vmul.f32 %v522_v7, %v506_v1 }
  0x21   : > { %556 = vst [vmem:[%s977_s10] sm:$0xff] %v552_v62  ;;  %v553_v8 = vsub.f32 %v541_v63, %v549_v51  ;;  %v562_v16 = vmul.f32 %v514_v6, %v506_v1  ;;  %v538_v17 = vmul.f32 %v818_v4, %v534_v9  ;;  %v566_v18 = vmul.f32 %v522_v7, %v498_v0 }
  0x22   : > { %588 = vst [vmem:[%s982_s12] sm:$0xff] %v584_v2  ;;  %v585_v13 = vadd.f32 %v581_v57, %v577_v3  ;;  %v574_v19 = vmul.f32 %v822_v5, %v534_v9  ;;  %v530_v22 = vsub.f32 %v518_v14, %v526_v15  ;;  %v550_v10 = vmul.f32 %v822_v5, %v546_v11 }
  0x23   : > { %557 = vst [vmem:[%s977_s10 + $0x8] sm:$0xff] %v553_v8  ;;  %v515_v24 = vperm.slane %v495_v12, 0  ;;  %v523_v25 = vperm.slane %v495_v12, 2  ;;  %v570_v26 = vadd.f32 %v566_v18, %v562_v16  ;;  %v582_v27 = vmul.f32 %v818_v4, %v546_v11 }
  0x24   : > { %589 = vst [vmem:[%s982_s12 + $0x8] sm:$0xff] %v585_v13  ;;  %v535_v29 = vperm.slane %v495_v12, 1  ;;  %v547_v30 = vperm.slane %v495_v12, 3  ;;  %v542_v31 = vadd.f32 %v538_v17, %v530_v22 }
  0x25   : > { %v519_v32 = vmul.f32 %v515_v24, %v499_v20  ;;  %v527_v33 = vmul.f32 %v523_v25, %v507_v21  ;;  %v563_v34 = vmul.f32 %v515_v24, %v507_v21  ;;  %v578_v35 = vadd.f32 %v574_v19, %v570_v26 }
  0x26   : > { %v539_v36 = vmul.f32 %v819_v23, %v535_v29  ;;  %v567_v37 = vmul.f32 %v523_v25, %v499_v20  ;;  %v554_v38 = vsub.f32 %v542_v31, %v550_v10  ;;  %v551_v40 = vmul.f32 %v823_v28, %v547_v30 }
  0x27   : > { %v531_v39 = vsub.f32 %v519_v32, %v527_v33  ;;  %v575_v41 = vmul.f32 %v823_v28, %v535_v29  ;;  %v586_v42 = vadd.f32 %v582_v27, %v578_v35  ;;  %v583_v44 = vmul.f32 %v819_v23, %v547_v30 }
  0x28   : > { %v571_v43 = vadd.f32 %v567_v37, %v563_v34  ;;  %558 = vst [vmem:[%s977_s10 + $0x10] sm:$0xff] %v554_v38 }
  0x29   : > { %v543_v45 = vadd.f32 %v539_v36, %v531_v39  ;;  %590 = vst [vmem:[%s982_s12 + $0x10] sm:$0xff] %v586_v42 }
  0x2a   : > { %v579_v46 = vadd.f32 %v575_v41, %v571_v43 }
  0x2b   : > { %v555_v47 = vsub.f32 %v543_v45, %v551_v40 }
  0x2c   : > { %v587_v48 = vadd.f32 %v583_v44, %v579_v46 }
  0x2d   : > { %559 = vst [vmem:[%s977_s10 + $0x18] sm:$0xff] %v555_v47 }
  0x2e   : > { %591 = vst [vmem:[%s982_s12 + $0x18] sm:$0xff] %v587_v48 }
  0x2f PF: > { %s17_s23 = sadd.s32 1, %s872_s23   ;;  %s1033_s21 = smov %s868_s22 }
  0x30   : > { %p14_p5 = scmp.ge.s32.totalorder %s17_s23, 4   ;;  %s1034_s22 = smov %s1036_s24 }
  0x32   :  { %16 = sbr.rel (!%p14_p5) target bundleno = 2 (0x2), region = 91 }

</bundles_post_ra>
